<compile_context>
chip_gen: v7x
topology: tpu7x:2x2x1
jax: 0.10.0
libtpu: 0.0.40
codegen_flags: <defaults>
</compile_context>

<pallas_src>
import math
import jax
import jax.numpy as jnp
from jax import lax
from jax.experimental import pallas as pl
from jax.experimental.pallas import tpu as pltpu

# ---------------- model config (small, synthetic) ----------------
VOCAB = 128
HIDDEN = 64
NUM_HEADS = 2
NUM_KV_HEADS = 1
HEAD_DIM = HIDDEN // NUM_HEADS            # 32
Q_SIZE = NUM_HEADS * HEAD_DIM             # 64
KV_SIZE = NUM_KV_HEADS * HEAD_DIM         # 32
QKV_SIZE = Q_SIZE + 2 * KV_SIZE           # 128
ROT_SLOTS = NUM_HEADS + NUM_KV_HEADS      # q heads + k heads that get RoPE
ROT_WIDTH = ROT_SLOTS * HEAD_DIM          # 96
INTERMEDIATE = 128
NUM_LAYERS = 2
RMS_EPS = 1e-6
ROPE_THETA = 10000.0
SEQ = 8
BATCH = 2
GROUP = NUM_HEADS // NUM_KV_HEADS         # query heads per KV head
HALF = HEAD_DIM // 2
SCALE = 1.0 / math.sqrt(HEAD_DIM)


# ---------------- in-kernel helpers ----------------
def _mm(a, b):
    """MXU matmul: bf16 operands, f32 accumulation."""
    return jnp.dot(a.astype(jnp.bfloat16), b.astype(jnp.bfloat16),
                   preferred_element_type=jnp.float32)


def _rms(x, w):
    """RMSNorm in f32. x: (T, H), w: (1, H) (already f32)."""
    var = jnp.mean(x * x, axis=-1, keepdims=True)
    return x * lax.rsqrt(var + RMS_EPS) * w


# ---------------- fused whole-model kernel (one grid step = one sequence) ----
def _model_kernel(tok_ref, cos_ref, sin_ref, embed_ref,
                  in_ln_ref, post_ln_ref, qkv_w_ref, qkv_b_ref,
                  o_w_ref, gu_w_ref, down_w_ref, final_ln_ref,
                  out_ref):
    T = out_ref.shape[0]

    # ---- embedding gather as a one-hot matmul (exact, MXU is otherwise idle) ----
    tok = tok_ref[...]                                               # (T, 1) int32
    vocab_iota = lax.broadcasted_iota(jnp.int32, (T, VOCAB), 1)
    onehot = (tok == vocab_iota).astype(jnp.float32)                 # (T, VOCAB)
    x = jnp.dot(onehot, embed_ref[...],
                preferred_element_type=jnp.float32)                  # (T, HIDDEN)

    cos = cos_ref[...]                                               # (T, ROT_WIDTH) f32
    sin = sin_ref[...]

    # ---- causal mask built directly at (GROUP*T, T); q position = row mod T ----
    rows = lax.broadcasted_iota(jnp.int32, (GROUP * T, T), 0)
    cols = lax.broadcasted_iota(jnp.int32, (GROUP * T, T), 1)
    if (T & (T - 1)) == 0:
        q_pos = jnp.bitwise_and(rows, T - 1)
    else:
        q_pos = lax.rem(rows, T)
    mask_stack = jnp.where(q_pos >= cols, 0.0, -1e30).astype(jnp.float32)

    def rope_block(blk):
        """Neox rotate-half applied once over a lane-dense multi-head block."""
        n = blk.shape[-1] // HEAD_DIM
        parts = []
        for h in range(n):
            x1 = blk[:, h * HEAD_DIM:h * HEAD_DIM + HALF]
            x2 = blk[:, h * HEAD_DIM + HALF:(h + 1) * HEAD_DIM]
            parts.append(-x2)
            parts.append(x1)
        rot = jnp.concatenate(parts, axis=-1)
        return blk * cos + rot * sin

    residual = None
    for l in range(NUM_LAYERS):
        # ---- input layernorm (+ fused residual add after layer 0) ----
        if residual is None:
            residual = x
            x = _rms(x, in_ln_ref[l])
        else:
            residual = x + residual
            x = _rms(residual, in_ln_ref[l])

        # ---- self attention (attention scale pre-folded into q weights/bias) ----
        qkv = _mm(x, qkv_w_ref[l]) + qkv_b_ref[l]                    # (T, 128) f32

        # RoPE once over the whole [q | k] block
        qk_rot = rope_block(qkv[:, :Q_SIZE + KV_SIZE])               # (T, ROT_WIDTH)

        o_w = o_w_ref[l]                                             # (Q_SIZE, HIDDEN) bf16
        attn_out = None
        for kv in range(NUM_KV_HEADS):
            k_rot = qk_rot[:, Q_SIZE + kv * HEAD_DIM:
                              Q_SIZE + (kv + 1) * HEAD_DIM]          # (T, D)
            v = qkv[:, Q_SIZE + KV_SIZE + kv * HEAD_DIM:
                       Q_SIZE + KV_SIZE + (kv + 1) * HEAD_DIM]       # (T, D)

            # stack this KV group's query heads along rows -> one score matmul
            q_stack = jnp.concatenate(
                [qk_rot[:, (kv * GROUP + g) * HEAD_DIM:
                           (kv * GROUP + g + 1) * HEAD_DIM]
                 for g in range(GROUP)], axis=0)                     # (G*T, D)

            s = lax.dot_general(
                q_stack.astype(jnp.bfloat16), k_rot.astype(jnp.bfloat16),
                (((1,), (1,)), ((), ())),
                preferred_element_type=jnp.float32)                  # (G*T, T) f32
            s = s + mask_stack
            s = s - jnp.max(s, axis=-1, keepdims=True)
            p = jnp.exp(s)
            p = p * pl.reciprocal(jnp.sum(p, axis=-1, keepdims=True), approx=True)

            o_stack = _mm(p, v)                                      # (G*T, D)

            # fold o_proj into the head unstack: sum of per-head partial matmuls
            for g in range(GROUP):
                h = kv * GROUP + g
                part = _mm(o_stack[g * T:(g + 1) * T, :],
                           o_w[h * HEAD_DIM:(h + 1) * HEAD_DIM, :])  # (T, HIDDEN)
                attn_out = part if attn_out is None else attn_out + part
        x = attn_out

        # ---- post-attention layernorm (fused residual add) ----
        residual = x + residual
        x = _rms(residual, post_ln_ref[l])

        # ---- MLP: SiLU(gate) * up -> down proj ----
        gu = _mm(x, gu_w_ref[l])                                     # (T, 2*INTER)
        gate = gu[:, :INTERMEDIATE]
        up = gu[:, INTERMEDIATE:]
        x = _mm(gate * jax.nn.sigmoid(gate) * up, down_w_ref[l])     # (T, HIDDEN)

    # ---- final norm: rms(hidden + residual) ----
    out_ref[...] = _rms(x + residual, final_ln_ref[...])


# ---------------- parameters (deterministic synthetic init) ----------------
def init_params(key):
    keys = jax.random.split(key, 1 + NUM_LAYERS)

    # fold attention scale into the q columns of qkv_w / qkv_b (RoPE is linear)
    col_scale = jnp.concatenate(
        [jnp.full((Q_SIZE,), SCALE, jnp.float32),
         jnp.ones((2 * KV_SIZE,), jnp.float32)])[None, :]            # (1, QKV_SIZE)

    qkv_w, qkv_b, o_w, gu_w, down_w = [], [], [], [], []
    for i in range(NUM_LAYERS):
        lk = jax.random.split(keys[1 + i], 5)
        w = 0.05 * jax.random.normal(lk[0], (HIDDEN, QKV_SIZE), jnp.float32)
        b = 0.05 * jax.random.normal(lk[1], (1, QKV_SIZE), jnp.float32)
        qkv_w.append((w * col_scale).astype(jnp.bfloat16))
        qkv_b.append(b * col_scale)
        o_w.append((0.05 * jax.random.normal(lk[2], (Q_SIZE, HIDDEN), jnp.float32)
                    ).astype(jnp.bfloat16))
        gu_w.append((0.05 * jax.random.normal(lk[3], (HIDDEN, 2 * INTERMEDIATE),
                                              jnp.float32)).astype(jnp.bfloat16))
        down_w.append((0.05 * jax.random.normal(lk[4], (INTERMEDIATE, HIDDEN),
                                                jnp.float32)).astype(jnp.bfloat16))

    return {
        "embed": 0.1 * jax.random.normal(keys[0], (VOCAB, HIDDEN), jnp.float32),
        "in_ln": jnp.ones((NUM_LAYERS, 1, HIDDEN), jnp.float32),
        "post_ln": jnp.ones((NUM_LAYERS, 1, HIDDEN), jnp.float32),
        "final_ln": jnp.ones((1, HIDDEN), jnp.float32),
        "qkv_w": jnp.stack(qkv_w),    # (L, HIDDEN, 128) bf16 (q cols pre-scaled)
        "qkv_b": jnp.stack(qkv_b),    # (L, 1, 128) f32     (q part pre-scaled)
        "o_w": jnp.stack(o_w),        # (L, 64, HIDDEN) bf16
        "gu_w": jnp.stack(gu_w),      # (L, HIDDEN, 256) bf16
        "down_w": jnp.stack(down_w),  # (L, 128, HIDDEN) bf16
    }


def rope_cos_sin(positions):
    """Neox-style rotary table; rotary_dim == head_dim. positions: (B, T)."""
    inv_freq = 1.0 / (
        ROPE_THETA ** (jnp.arange(0, HEAD_DIM, 2, dtype=jnp.float32) / HEAD_DIM)
    )
    freqs = positions.astype(jnp.float32)[..., None] * inv_freq      # (B, T, D/2)
    cos = jnp.concatenate([jnp.cos(freqs), jnp.cos(freqs)], axis=-1)  # (B, T, D)
    sin = jnp.concatenate([jnp.sin(freqs), jnp.sin(freqs)], axis=-1)  # (B, T, D)
    return cos, sin


def _idx_batch(b):
    return (b, 0, 0)


def _full_spec(shape):
    """Whole-array block, broadcast across the batch grid axis."""
    return pl.BlockSpec(shape, lambda b, _n=len(shape): (0,) * _n)


# ---------------- full model forward (one fused pallas_call, grid over batch) ----
@jax.jit
def qwen2_forward(params, tokens, positions):
    B, T = tokens.shape
    cos, sin = rope_cos_sin(positions)                      # (B, T, HEAD_DIM)
    cos_qk = jnp.tile(cos, (1, 1, ROT_SLOTS))               # (B, T, ROT_WIDTH)
    sin_qk = jnp.tile(sin, (1, 1, ROT_SLOTS))
    tok3 = tokens.astype(jnp.int32)[..., None]              # (B, T, 1)

    return pl.pallas_call(
        _model_kernel,
        out_shape=jax.ShapeDtypeStruct((B, T, HIDDEN), jnp.float32),
        grid=(B,),
        in_specs=[
            pl.BlockSpec((None, T, 1), _idx_batch),           # tokens
            pl.BlockSpec((None, T, ROT_WIDTH), _idx_batch),   # cos (per-head tiled)
            pl.BlockSpec((None, T, ROT_WIDTH), _idx_batch),   # sin
            _full_spec((VOCAB, HIDDEN)),                      # embed table
            _full_spec((NUM_LAYERS, 1, HIDDEN)),              # in_ln
            _full_spec((NUM_LAYERS, 1, HIDDEN)),              # post_ln
            _full_spec((NUM_LAYERS, HIDDEN, QKV_SIZE)),       # qkv_w
            _full_spec((NUM_LAYERS, 1, QKV_SIZE)),            # qkv_b
            _full_spec((NUM_LAYERS, Q_SIZE, HIDDEN)),         # o_w
            _full_spec((NUM_LAYERS, HIDDEN, 2 * INTERMEDIATE)),  # gu_w
            _full_spec((NUM_LAYERS, INTERMEDIATE, HIDDEN)),   # down_w
            _full_spec((1, HIDDEN)),                          # final_ln
        ],
        out_specs=pl.BlockSpec((None, T, HIDDEN), _idx_batch),
        compiler_params=pltpu.CompilerParams(
            dimension_semantics=("parallel",)),               # v7x: shard batch over 2 TCs
    )(tok3, cos_qk, sin_qk,
      params["embed"], params["in_ln"], params["post_ln"],
      params["qkv_w"], params["qkv_b"], params["o_w"],
      params["gu_w"], params["down_w"], params["final_ln"])


# TODO(synk): KV-cache / paged InputData machinery of FlashAttention is not
# modeled; this kernel implements batched single-sequence causal prefill
# attention with dense (T,T) scores (fine at T=8; needs a KV-blocked
# flash-style loop before T grows).

if __name__ == "__main__":
    key = jax.random.PRNGKey(0)
    pkey, tkey = jax.random.split(key)
    params = init_params(pkey)
    tokens = jax.random.randint(tkey, (BATCH, SEQ), 0, VOCAB, dtype=jnp.int32)
    positions = jnp.tile(jnp.arange(SEQ, dtype=jnp.int32)[None, :], (BATCH, 1))

    out = qwen2_forward(params, tokens, positions)
    out = jax.block_until_ready(out)
    assert out.shape == (BATCH, SEQ, HIDDEN)
    assert bool(jnp.all(jnp.isfinite(out)))
    print("KERNEL_OK")
</pallas_src>

<mosaic_0001>
module attributes {stable_mosaic.version = 11 : i64} {
  func.func @_model_kernel(%arg0: i32, %arg1: memref<1x8x1xi32, #tpu.memory_space<vmem>>, %arg2: memref<1x8x96xf32, #tpu.memory_space<vmem>>, %arg3: memref<1x8x96xf32, #tpu.memory_space<vmem>>, %arg4: memref<128x64xf32, #tpu.memory_space<vmem>>, %arg5: memref<2x1x64xf32, #tpu.memory_space<vmem>>, %arg6: memref<2x1x64xf32, #tpu.memory_space<vmem>>, %arg7: memref<2x64x128xbf16, #tpu.memory_space<vmem>>, %arg8: memref<2x1x128xf32, #tpu.memory_space<vmem>>, %arg9: memref<2x64x64xbf16, #tpu.memory_space<vmem>>, %arg10: memref<2x64x256xbf16, #tpu.memory_space<vmem>>, %arg11: memref<2x128x64xbf16, #tpu.memory_space<vmem>>, %arg12: memref<1x64xf32, #tpu.memory_space<vmem>>, %arg13: memref<1x8x64xf32, #tpu.memory_space<vmem>>) attributes {dimension_semantics = [#tpu.dimension_semantics<parallel>], iteration_bounds = array<i64: 2>, scalar_prefetch = 0 : i64, scratch_operands = 0 : i64, tpu.core_type = #tpu.core_type<tc>, window_params = [{transform_indices = @transform_0, window_bounds = array<i64: 1, 8, 1>}, {transform_indices = @transform_1, window_bounds = array<i64: 1, 8, 96>}, {transform_indices = @transform_2, window_bounds = array<i64: 1, 8, 96>}, {pipeline_mode = #tpu.pipeline_mode<synchronous>, transform_indices = @transform_3, window_bounds = array<i64: 128, 64>}, {pipeline_mode = #tpu.pipeline_mode<synchronous>, transform_indices = @transform_4, window_bounds = array<i64: 2, 1, 64>}, {pipeline_mode = #tpu.pipeline_mode<synchronous>, transform_indices = @transform_5, window_bounds = array<i64: 2, 1, 64>}, {pipeline_mode = #tpu.pipeline_mode<synchronous>, transform_indices = @transform_6, window_bounds = array<i64: 2, 64, 128>}, {pipeline_mode = #tpu.pipeline_mode<synchronous>, transform_indices = @transform_7, window_bounds = array<i64: 2, 1, 128>}, {pipeline_mode = #tpu.pipeline_mode<synchronous>, transform_indices = @transform_8, window_bounds = array<i64: 2, 64, 64>}, {pipeline_mode = #tpu.pipeline_mode<synchronous>, transform_indices = @transform_9, window_bounds = array<i64: 2, 64, 256>}, {pipeline_mode = #tpu.pipeline_mode<synchronous>, transform_indices = @transform_10, window_bounds = array<i64: 2, 128, 64>}, {pipeline_mode = #tpu.pipeline_mode<synchronous>, transform_indices = @transform_11, window_bounds = array<i64: 1, 64>}, {transform_indices = @transform_12, window_bounds = array<i64: 1, 8, 64>}]} {
    %c0 = arith.constant 0 : index
    %c0_0 = arith.constant 0 : index
    %c0_1 = arith.constant 0 : index
    %0 = vector.load %arg1[%c0, %c0_0, %c0_1] : memref<1x8x1xi32, #tpu.memory_space<vmem>>, vector<1x8x1xi32>
    %1 = vector.shape_cast %0 : vector<1x8x1xi32> to vector<8x1xi32>
    %2 = tpu.iota {dimensions = array<i32: 1>} : vector<8x128xi32>
    %3 = vector.broadcast %1 : vector<8x1xi32> to vector<8x128xi32>
    %4 = arith.cmpi eq, %3, %2 : vector<8x128xi32>
    %5 = arith.extui %4 : vector<8x128xi1> to vector<8x128xi32>
    %6 = arith.sitofp %5 : vector<8x128xi32> to vector<8x128xf32>
    %c0_2 = arith.constant 0 : index
    %c0_3 = arith.constant 0 : index
    %7 = vector.load %arg4[%c0_2, %c0_3] : memref<128x64xf32, #tpu.memory_space<vmem>>, vector<128x64xf32>
    %cst = arith.constant dense<0.000000e+00> : vector<8x64xf32>
    %8 = tpu.matmul %6, %7, %cst {dimension_numbers = #tpu.dot_dimension_numbers<[1], [0], [0], [1], [0, 0, 1, 1], [], []>} : vector<8x128xf32>, vector<128x64xf32>, vector<8x64xf32> -> vector<8x64xf32>
    %c0_4 = arith.constant 0 : index
    %c0_5 = arith.constant 0 : index
    %c0_6 = arith.constant 0 : index
    %9 = vector.load %arg2[%c0_4, %c0_5, %c0_6] : memref<1x8x96xf32, #tpu.memory_space<vmem>>, vector<1x8x96xf32>
    %10 = vector.shape_cast %9 : vector<1x8x96xf32> to vector<8x96xf32>
    %c0_7 = arith.constant 0 : index
    %c0_8 = arith.constant 0 : index
    %c0_9 = arith.constant 0 : index
    %11 = vector.load %arg3[%c0_7, %c0_8, %c0_9] : memref<1x8x96xf32, #tpu.memory_space<vmem>>, vector<1x8x96xf32>
    %12 = vector.shape_cast %11 : vector<1x8x96xf32> to vector<8x96xf32>
    %13 = tpu.iota {dimensions = array<i32: 0>} : vector<16x8xi32>
    %14 = tpu.iota {dimensions = array<i32: 1>} : vector<16x8xi32>
    %c7_i32 = arith.constant 7 : i32
    %15 = vector.broadcast %c7_i32 : i32 to vector<16x8xi32>
    %16 = arith.andi %13, %15 : vector<16x8xi32>
    %17 = arith.cmpi sge, %16, %14 : vector<16x8xi32>
    %cst_10 = arith.constant 0.000000e+00 : f32
    %cst_11 = arith.constant -1.000000e+30 : f32
    %18 = vector.broadcast %cst_10 : f32 to vector<16x8xf32>
    %19 = vector.broadcast %cst_11 : f32 to vector<16x8xf32>
    %20 = arith.select %17, %18, %19 : vector<16x8xi1>, vector<16x8xf32>
    %c0_12 = arith.constant 0 : index
    %c0_13 = arith.constant 0 : index
    %c0_14 = arith.constant 0 : index
    %21 = vector.load %arg5[%c0_12, %c0_13, %c0_14] : memref<2x1x64xf32, #tpu.memory_space<vmem>>, vector<1x1x64xf32>
    %22 = vector.shape_cast %21 : vector<1x1x64xf32> to vector<1x64xf32>
    %23 = arith.mulf %8, %8 : vector<8x64xf32>
    %cst_15 = arith.constant dense<0.000000e+00> : vector<8xf32>
    %24 = vector.multi_reduction <add>, %23, %cst_15 [1] : vector<8x64xf32> to vector<8xf32>
    %25 = vector.shape_cast %24 : vector<8xf32> to vector<8x1xf32>
    %cst_16 = arith.constant 6.400000e+01 : f32
    %26 = vector.broadcast %cst_16 : f32 to vector<8x1xf32>
    %27 = arith.divf %25, %26 : vector<8x1xf32>
    %cst_17 = arith.constant 9.99999997E-7 : f32
    %28 = vector.broadcast %cst_17 : f32 to vector<8x1xf32>
    %29 = arith.addf %27, %28 : vector<8x1xf32>
    %30 = math.rsqrt %29 : vector<8x1xf32>
    %31 = vector.broadcast %30 : vector<8x1xf32> to vector<8x64xf32>
    %32 = arith.mulf %8, %31 : vector<8x64xf32>
    %33 = vector.broadcast %22 : vector<1x64xf32> to vector<8x64xf32>
    %34 = arith.mulf %32, %33 : vector<8x64xf32>
    %c0_18 = arith.constant 0 : index
    %c0_19 = arith.constant 0 : index
    %c0_20 = arith.constant 0 : index
    %35 = vector.load %arg7[%c0_18, %c0_19, %c0_20] : memref<2x64x128xbf16, #tpu.memory_space<vmem>>, vector<1x64x128xbf16>
    %36 = vector.shape_cast %35 : vector<1x64x128xbf16> to vector<64x128xbf16>
    %37 = arith.truncf %34 : vector<8x64xf32> to vector<8x64xbf16>
    %cst_21 = arith.constant dense<0.000000e+00> : vector<8x128xf32>
    %38 = tpu.matmul %37, %36, %cst_21 {dimension_numbers = #tpu.dot_dimension_numbers<[1], [0], [0], [1], [0, 0, 1, 1], [], []>} : vector<8x64xbf16>, vector<64x128xbf16>, vector<8x128xf32> -> vector<8x128xf32>
    %c0_22 = arith.constant 0 : index
    %c0_23 = arith.constant 0 : index
    %c0_24 = arith.constant 0 : index
    %39 = vector.load %arg8[%c0_22, %c0_23, %c0_24] : memref<2x1x128xf32, #tpu.memory_space<vmem>>, vector<1x1x128xf32>
    %40 = vector.shape_cast %39 : vector<1x1x128xf32> to vector<1x128xf32>
    %41 = vector.broadcast %40 : vector<1x128xf32> to vector<8x128xf32>
    %42 = arith.addf %38, %41 : vector<8x128xf32>
    %43 = vector.extract_strided_slice %42 {offsets = [0, 0], sizes = [8, 96], strides = [1, 1]} : vector<8x128xf32> to vector<8x96xf32>
    %44 = vector.extract_strided_slice %43 {offsets = [0, 0], sizes = [8, 16], strides = [1, 1]} : vector<8x96xf32> to vector<8x16xf32>
    %45 = vector.extract_strided_slice %43 {offsets = [0, 16], sizes = [8, 16], strides = [1, 1]} : vector<8x96xf32> to vector<8x16xf32>
    %cst_25 = arith.constant 0.000000e+00 : f32
    %46 = vector.broadcast %cst_25 : f32 to vector<8x16xf32>
    %47 = arith.subf %46, %45 : vector<8x16xf32>
    %48 = vector.extract_strided_slice %43 {offsets = [0, 32], sizes = [8, 16], strides = [1, 1]} : vector<8x96xf32> to vector<8x16xf32>
    %49 = vector.extract_strided_slice %43 {offsets = [0, 48], sizes = [8, 16], strides = [1, 1]} : vector<8x96xf32> to vector<8x16xf32>
    %cst_26 = arith.constant 0.000000e+00 : f32
    %50 = vector.broadcast %cst_26 : f32 to vector<8x16xf32>
    %51 = arith.subf %50, %49 : vector<8x16xf32>
    %52 = vector.extract_strided_slice %43 {offsets = [0, 64], sizes = [8, 16], strides = [1, 1]} : vector<8x96xf32> to vector<8x16xf32>
    %53 = vector.extract_strided_slice %43 {offsets = [0, 80], sizes = [8, 16], strides = [1, 1]} : vector<8x96xf32> to vector<8x16xf32>
    %cst_27 = arith.constant 0.000000e+00 : f32
    %54 = vector.broadcast %cst_27 : f32 to vector<8x16xf32>
    %55 = arith.subf %54, %53 : vector<8x16xf32>
    %56 = tpu.concatenate %47, %44, %51, %48, %55, %52 in 1 : vector<8x16xf32>, vector<8x16xf32>, vector<8x16xf32>, vector<8x16xf32>, vector<8x16xf32>, vector<8x16xf32> -> vector<8x96xf32>
    %57 = arith.mulf %43, %10 : vector<8x96xf32>
    %58 = arith.mulf %56, %12 : vector<8x96xf32>
    %59 = arith.addf %57, %58 : vector<8x96xf32>
    %c0_28 = arith.constant 0 : index
    %c0_29 = arith.constant 0 : index
    %c0_30 = arith.constant 0 : index
    %60 = vector.load %arg9[%c0_28, %c0_29, %c0_30] : memref<2x64x64xbf16, #tpu.memory_space<vmem>>, vector<1x64x64xbf16>
    %61 = vector.shape_cast %60 : vector<1x64x64xbf16> to vector<64x64xbf16>
    %62 = vector.extract_strided_slice %59 {offsets = [0, 64], sizes = [8, 32], strides = [1, 1]} : vector<8x96xf32> to vector<8x32xf32>
    %63 = vector.extract_strided_slice %42 {offsets = [0, 96], sizes = [8, 32], strides = [1, 1]} : vector<8x128xf32> to vector<8x32xf32>
    %64 = vector.extract_strided_slice %59 {offsets = [0, 0], sizes = [8, 32], strides = [1, 1]} : vector<8x96xf32> to vector<8x32xf32>
    %65 = vector.extract_strided_slice %59 {offsets = [0, 32], sizes = [8, 32], strides = [1, 1]} : vector<8x96xf32> to vector<8x32xf32>
    %66 = tpu.concatenate %64, %65 in 0 : vector<8x32xf32>, vector<8x32xf32> -> vector<16x32xf32>
    %67 = arith.truncf %66 : vector<16x32xf32> to vector<16x32xbf16>
    %68 = arith.truncf %62 : vector<8x32xf32> to vector<8x32xbf16>
    %cst_31 = arith.constant dense<0.000000e+00> : vector<16x8xf32>
    %69 = tpu.matmul %67, %68, %cst_31 {dimension_numbers = #tpu.dot_dimension_numbers<[1], [1], [0], [0], [0, 0, 1, 0], [], []>} : vector<16x32xbf16>, vector<8x32xbf16>, vector<16x8xf32> -> vector<16x8xf32>
    %70 = arith.addf %69, %20 : vector<16x8xf32>
    %cst_32 = arith.constant dense<0xFF800000> : vector<16xf32>
    %71 = vector.multi_reduction <maximumf>, %70, %cst_32 [1] : vector<16x8xf32> to vector<16xf32>
    %72 = vector.shape_cast %71 : vector<16xf32> to vector<16x1xf32>
    %73 = vector.broadcast %72 : vector<16x1xf32> to vector<16x8xf32>
    %74 = arith.subf %70, %73 : vector<16x8xf32>
    %75 = math.exp %74 : vector<16x8xf32>
    %cst_33 = arith.constant dense<0.000000e+00> : vector<16xf32>
    %76 = vector.multi_reduction <add>, %75, %cst_33 [1] : vector<16x8xf32> to vector<16xf32>
    %77 = vector.shape_cast %76 : vector<16xf32> to vector<16x1xf32>
    %78 = tpu.reciprocal %77 {approx = true} : vector<16x1xf32> -> vector<16x1xf32>
    %79 = vector.broadcast %78 : vector<16x1xf32> to vector<16x8xf32>
    %80 = arith.mulf %75, %79 : vector<16x8xf32>
    %81 = arith.truncf %80 : vector<16x8xf32> to vector<16x8xbf16>
    %82 = arith.truncf %63 : vector<8x32xf32> to vector<8x32xbf16>
    %cst_34 = arith.constant dense<0.000000e+00> : vector<16x32xf32>
    %83 = tpu.matmul %81, %82, %cst_34 {dimension_numbers = #tpu.dot_dimension_numbers<[1], [0], [0], [1], [0, 0, 1, 1], [], []>} : vector<16x8xbf16>, vector<8x32xbf16>, vector<16x32xf32> -> vector<16x32xf32>
    %84 = vector.extract_strided_slice %83 {offsets = [0, 0], sizes = [8, 32], strides = [1, 1]} : vector<16x32xf32> to vector<8x32xf32>
    %85 = vector.extract_strided_slice %61 {offsets = [0, 0], sizes = [32, 64], strides = [1, 1]} : vector<64x64xbf16> to vector<32x64xbf16>
    %86 = arith.truncf %84 : vector<8x32xf32> to vector<8x32xbf16>
    %cst_35 = arith.constant dense<0.000000e+00> : vector<8x64xf32>
    %87 = tpu.matmul %86, %85, %cst_35 {dimension_numbers = #tpu.dot_dimension_numbers<[1], [0], [0], [1], [0, 0, 1, 1], [], []>} : vector<8x32xbf16>, vector<32x64xbf16>, vector<8x64xf32> -> vector<8x64xf32>
    %88 = vector.extract_strided_slice %83 {offsets = [8, 0], sizes = [8, 32], strides = [1, 1]} : vector<16x32xf32> to vector<8x32xf32>
    %89 = vector.extract_strided_slice %61 {offsets = [32, 0], sizes = [32, 64], strides = [1, 1]} : vector<64x64xbf16> to vector<32x64xbf16>
    %90 = arith.truncf %88 : vector<8x32xf32> to vector<8x32xbf16>
    %cst_36 = arith.constant dense<0.000000e+00> : vector<8x64xf32>
    %91 = tpu.matmul %90, %89, %cst_36 {dimension_numbers = #tpu.dot_dimension_numbers<[1], [0], [0], [1], [0, 0, 1, 1], [], []>} : vector<8x32xbf16>, vector<32x64xbf16>, vector<8x64xf32> -> vector<8x64xf32>
    %92 = arith.addf %87, %91 : vector<8x64xf32>
    %93 = arith.addf %92, %8 : vector<8x64xf32>
    %c0_37 = arith.constant 0 : index
    %c0_38 = arith.constant 0 : index
    %c0_39 = arith.constant 0 : index
    %94 = vector.load %arg6[%c0_37, %c0_38, %c0_39] : memref<2x1x64xf32, #tpu.memory_space<vmem>>, vector<1x1x64xf32>
    %95 = vector.shape_cast %94 : vector<1x1x64xf32> to vector<1x64xf32>
    %96 = arith.mulf %93, %93 : vector<8x64xf32>
    %cst_40 = arith.constant dense<0.000000e+00> : vector<8xf32>
    %97 = vector.multi_reduction <add>, %96, %cst_40 [1] : vector<8x64xf32> to vector<8xf32>
    %98 = vector.shape_cast %97 : vector<8xf32> to vector<8x1xf32>
    %cst_41 = arith.constant 6.400000e+01 : f32
    %99 = vector.broadcast %cst_41 : f32 to vector<8x1xf32>
    %100 = arith.divf %98, %99 : vector<8x1xf32>
    %cst_42 = arith.constant 9.99999997E-7 : f32
    %101 = vector.broadcast %cst_42 : f32 to vector<8x1xf32>
    %102 = arith.addf %100, %101 : vector<8x1xf32>
    %103 = math.rsqrt %102 : vector<8x1xf32>
    %104 = vector.broadcast %103 : vector<8x1xf32> to vector<8x64xf32>
    %105 = arith.mulf %93, %104 : vector<8x64xf32>
    %106 = vector.broadcast %95 : vector<1x64xf32> to vector<8x64xf32>
    %107 = arith.mulf %105, %106 : vector<8x64xf32>
    %c0_43 = arith.constant 0 : index
    %c0_44 = arith.constant 0 : index
    %c0_45 = arith.constant 0 : index
    %108 = vector.load %arg10[%c0_43, %c0_44, %c0_45] : memref<2x64x256xbf16, #tpu.memory_space<vmem>>, vector<1x64x256xbf16>
    %109 = vector.shape_cast %108 : vector<1x64x256xbf16> to vector<64x256xbf16>
    %110 = arith.truncf %107 : vector<8x64xf32> to vector<8x64xbf16>
    %cst_46 = arith.constant dense<0.000000e+00> : vector<8x256xf32>
    %111 = tpu.matmul %110, %109, %cst_46 {dimension_numbers = #tpu.dot_dimension_numbers<[1], [0], [0], [1], [0, 0, 1, 1], [], []>} : vector<8x64xbf16>, vector<64x256xbf16>, vector<8x256xf32> -> vector<8x256xf32>
    %112 = vector.extract_strided_slice %111 {offsets = [0, 0], sizes = [8, 128], strides = [1, 1]} : vector<8x256xf32> to vector<8x128xf32>
    %113 = vector.extract_strided_slice %111 {offsets = [0, 128], sizes = [8, 128], strides = [1, 1]} : vector<8x256xf32> to vector<8x128xf32>
    %114 = arith.negf %112 : vector<8x128xf32>
    %115 = math.exp %114 : vector<8x128xf32>
    %cst_47 = arith.constant 1.000000e+00 : f32
    %116 = vector.broadcast %cst_47 : f32 to vector<8x128xf32>
    %117 = arith.addf %116, %115 : vector<8x128xf32>
    %118 = arith.divf %116, %117 : vector<8x128xf32>
    %119 = arith.mulf %112, %118 : vector<8x128xf32>
    %120 = arith.mulf %119, %113 : vector<8x128xf32>
    %c0_48 = arith.constant 0 : index
    %c0_49 = arith.constant 0 : index
    %c0_50 = arith.constant 0 : index
    %121 = vector.load %arg11[%c0_48, %c0_49, %c0_50] : memref<2x128x64xbf16, #tpu.memory_space<vmem>>, vector<1x128x64xbf16>
    %122 = vector.shape_cast %121 : vector<1x128x64xbf16> to vector<128x64xbf16>
    %123 = arith.truncf %120 : vector<8x128xf32> to vector<8x128xbf16>
    %cst_51 = arith.constant dense<0.000000e+00> : vector<8x64xf32>
    %124 = tpu.matmul %123, %122, %cst_51 {dimension_numbers = #tpu.dot_dimension_numbers<[1], [0], [0], [1], [0, 0, 1, 1], [], []>} : vector<8x128xbf16>, vector<128x64xbf16>, vector<8x64xf32> -> vector<8x64xf32>
    %125 = arith.addf %124, %93 : vector<8x64xf32>
    %c1 = arith.constant 1 : index
    %c0_52 = arith.constant 0 : index
    %c0_53 = arith.constant 0 : index
    %126 = vector.load %arg5[%c1, %c0_52, %c0_53] : memref<2x1x64xf32, #tpu.memory_space<vmem>>, vector<1x1x64xf32>
    %127 = vector.shape_cast %126 : vector<1x1x64xf32> to vector<1x64xf32>
    %128 = arith.mulf %125, %125 : vector<8x64xf32>
    %cst_54 = arith.constant dense<0.000000e+00> : vector<8xf32>
    %129 = vector.multi_reduction <add>, %128, %cst_54 [1] : vector<8x64xf32> to vector<8xf32>
    %130 = vector.shape_cast %129 : vector<8xf32> to vector<8x1xf32>
    %cst_55 = arith.constant 6.400000e+01 : f32
    %131 = vector.broadcast %cst_55 : f32 to vector<8x1xf32>
    %132 = arith.divf %130, %131 : vector<8x1xf32>
    %cst_56 = arith.constant 9.99999997E-7 : f32
    %133 = vector.broadcast %cst_56 : f32 to vector<8x1xf32>
    %134 = arith.addf %132, %133 : vector<8x1xf32>
    %135 = math.rsqrt %134 : vector<8x1xf32>
    %136 = vector.broadcast %135 : vector<8x1xf32> to vector<8x64xf32>
    %137 = arith.mulf %125, %136 : vector<8x64xf32>
    %138 = vector.broadcast %127 : vector<1x64xf32> to vector<8x64xf32>
    %139 = arith.mulf %137, %138 : vector<8x64xf32>
    %c1_57 = arith.constant 1 : index
    %c0_58 = arith.constant 0 : index
    %c0_59 = arith.constant 0 : index
    %140 = vector.load %arg7[%c1_57, %c0_58, %c0_59] : memref<2x64x128xbf16, #tpu.memory_space<vmem>>, vector<1x64x128xbf16>
    %141 = vector.shape_cast %140 : vector<1x64x128xbf16> to vector<64x128xbf16>
    %142 = arith.truncf %139 : vector<8x64xf32> to vector<8x64xbf16>
    %cst_60 = arith.constant dense<0.000000e+00> : vector<8x128xf32>
    %143 = tpu.matmul %142, %141, %cst_60 {dimension_numbers = #tpu.dot_dimension_numbers<[1], [0], [0], [1], [0, 0, 1, 1], [], []>} : vector<8x64xbf16>, vector<64x128xbf16>, vector<8x128xf32> -> vector<8x128xf32>
    %c1_61 = arith.constant 1 : index
    %c0_62 = arith.constant 0 : index
    %c0_63 = arith.constant 0 : index
    %144 = vector.load %arg8[%c1_61, %c0_62, %c0_63] : memref<2x1x128xf32, #tpu.memory_space<vmem>>, vector<1x1x128xf32>
    %145 = vector.shape_cast %144 : vector<1x1x128xf32> to vector<1x128xf32>
    %146 = vector.broadcast %145 : vector<1x128xf32> to vector<8x128xf32>
    %147 = arith.addf %143, %146 : vector<8x128xf32>
    %148 = vector.extract_strided_slice %147 {offsets = [0, 0], sizes = [8, 96], strides = [1, 1]} : vector<8x128xf32> to vector<8x96xf32>
    %149 = vector.extract_strided_slice %148 {offsets = [0, 0], sizes = [8, 16], strides = [1, 1]} : vector<8x96xf32> to vector<8x16xf32>
    %150 = vector.extract_strided_slice %148 {offsets = [0, 16], sizes = [8, 16], strides = [1, 1]} : vector<8x96xf32> to vector<8x16xf32>
    %cst_64 = arith.constant 0.000000e+00 : f32
    %151 = vector.broadcast %cst_64 : f32 to vector<8x16xf32>
    %152 = arith.subf %151, %150 : vector<8x16xf32>
    %153 = vector.extract_strided_slice %148 {offsets = [0, 32], sizes = [8, 16], strides = [1, 1]} : vector<8x96xf32> to vector<8x16xf32>
    %154 = vector.extract_strided_slice %148 {offsets = [0, 48], sizes = [8, 16], strides = [1, 1]} : vector<8x96xf32> to vector<8x16xf32>
    %cst_65 = arith.constant 0.000000e+00 : f32
    %155 = vector.broadcast %cst_65 : f32 to vector<8x16xf32>
    %156 = arith.subf %155, %154 : vector<8x16xf32>
    %157 = vector.extract_strided_slice %148 {offsets = [0, 64], sizes = [8, 16], strides = [1, 1]} : vector<8x96xf32> to vector<8x16xf32>
    %158 = vector.extract_strided_slice %148 {offsets = [0, 80], sizes = [8, 16], strides = [1, 1]} : vector<8x96xf32> to vector<8x16xf32>
    %cst_66 = arith.constant 0.000000e+00 : f32
    %159 = vector.broadcast %cst_66 : f32 to vector<8x16xf32>
    %160 = arith.subf %159, %158 : vector<8x16xf32>
    %161 = tpu.concatenate %152, %149, %156, %153, %160, %157 in 1 : vector<8x16xf32>, vector<8x16xf32>, vector<8x16xf32>, vector<8x16xf32>, vector<8x16xf32>, vector<8x16xf32> -> vector<8x96xf32>
    %162 = arith.mulf %148, %10 : vector<8x96xf32>
    %163 = arith.mulf %161, %12 : vector<8x96xf32>
    %164 = arith.addf %162, %163 : vector<8x96xf32>
    %c1_67 = arith.constant 1 : index
    %c0_68 = arith.constant 0 : index
    %c0_69 = arith.constant 0 : index
    %165 = vector.load %arg9[%c1_67, %c0_68, %c0_69] : memref<2x64x64xbf16, #tpu.memory_space<vmem>>, vector<1x64x64xbf16>
    %166 = vector.shape_cast %165 : vector<1x64x64xbf16> to vector<64x64xbf16>
    %167 = vector.extract_strided_slice %164 {offsets = [0, 64], sizes = [8, 32], strides = [1, 1]} : vector<8x96xf32> to vector<8x32xf32>
    %168 = vector.extract_strided_slice %147 {offsets = [0, 96], sizes = [8, 32], strides = [1, 1]} : vector<8x128xf32> to vector<8x32xf32>
    %169 = vector.extract_strided_slice %164 {offsets = [0, 0], sizes = [8, 32], strides = [1, 1]} : vector<8x96xf32> to vector<8x32xf32>
    %170 = vector.extract_strided_slice %164 {offsets = [0, 32], sizes = [8, 32], strides = [1, 1]} : vector<8x96xf32> to vector<8x32xf32>
    %171 = tpu.concatenate %169, %170 in 0 : vector<8x32xf32>, vector<8x32xf32> -> vector<16x32xf32>
    %172 = arith.truncf %171 : vector<16x32xf32> to vector<16x32xbf16>
    %173 = arith.truncf %167 : vector<8x32xf32> to vector<8x32xbf16>
    %cst_70 = arith.constant dense<0.000000e+00> : vector<16x8xf32>
    %174 = tpu.matmul %172, %173, %cst_70 {dimension_numbers = #tpu.dot_dimension_numbers<[1], [1], [0], [0], [0, 0, 1, 0], [], []>} : vector<16x32xbf16>, vector<8x32xbf16>, vector<16x8xf32> -> vector<16x8xf32>
    %175 = arith.addf %174, %20 : vector<16x8xf32>
    %cst_71 = arith.constant dense<0xFF800000> : vector<16xf32>
    %176 = vector.multi_reduction <maximumf>, %175, %cst_71 [1] : vector<16x8xf32> to vector<16xf32>
    %177 = vector.shape_cast %176 : vector<16xf32> to vector<16x1xf32>
    %178 = vector.broadcast %177 : vector<16x1xf32> to vector<16x8xf32>
    %179 = arith.subf %175, %178 : vector<16x8xf32>
    %180 = math.exp %179 : vector<16x8xf32>
    %cst_72 = arith.constant dense<0.000000e+00> : vector<16xf32>
    %181 = vector.multi_reduction <add>, %180, %cst_72 [1] : vector<16x8xf32> to vector<16xf32>
    %182 = vector.shape_cast %181 : vector<16xf32> to vector<16x1xf32>
    %183 = tpu.reciprocal %182 {approx = true} : vector<16x1xf32> -> vector<16x1xf32>
    %184 = vector.broadcast %183 : vector<16x1xf32> to vector<16x8xf32>
    %185 = arith.mulf %180, %184 : vector<16x8xf32>
    %186 = arith.truncf %185 : vector<16x8xf32> to vector<16x8xbf16>
    %187 = arith.truncf %168 : vector<8x32xf32> to vector<8x32xbf16>
    %cst_73 = arith.constant dense<0.000000e+00> : vector<16x32xf32>
    %188 = tpu.matmul %186, %187, %cst_73 {dimension_numbers = #tpu.dot_dimension_numbers<[1], [0], [0], [1], [0, 0, 1, 1], [], []>} : vector<16x8xbf16>, vector<8x32xbf16>, vector<16x32xf32> -> vector<16x32xf32>
    %189 = vector.extract_strided_slice %188 {offsets = [0, 0], sizes = [8, 32], strides = [1, 1]} : vector<16x32xf32> to vector<8x32xf32>
    %190 = vector.extract_strided_slice %166 {offsets = [0, 0], sizes = [32, 64], strides = [1, 1]} : vector<64x64xbf16> to vector<32x64xbf16>
    %191 = arith.truncf %189 : vector<8x32xf32> to vector<8x32xbf16>
    %cst_74 = arith.constant dense<0.000000e+00> : vector<8x64xf32>
    %192 = tpu.matmul %191, %190, %cst_74 {dimension_numbers = #tpu.dot_dimension_numbers<[1], [0], [0], [1], [0, 0, 1, 1], [], []>} : vector<8x32xbf16>, vector<32x64xbf16>, vector<8x64xf32> -> vector<8x64xf32>
    %193 = vector.extract_strided_slice %188 {offsets = [8, 0], sizes = [8, 32], strides = [1, 1]} : vector<16x32xf32> to vector<8x32xf32>
    %194 = vector.extract_strided_slice %166 {offsets = [32, 0], sizes = [32, 64], strides = [1, 1]} : vector<64x64xbf16> to vector<32x64xbf16>
    %195 = arith.truncf %193 : vector<8x32xf32> to vector<8x32xbf16>
    %cst_75 = arith.constant dense<0.000000e+00> : vector<8x64xf32>
    %196 = tpu.matmul %195, %194, %cst_75 {dimension_numbers = #tpu.dot_dimension_numbers<[1], [0], [0], [1], [0, 0, 1, 1], [], []>} : vector<8x32xbf16>, vector<32x64xbf16>, vector<8x64xf32> -> vector<8x64xf32>
    %197 = arith.addf %192, %196 : vector<8x64xf32>
    %198 = arith.addf %197, %125 : vector<8x64xf32>
    %c1_76 = arith.constant 1 : index
    %c0_77 = arith.constant 0 : index
    %c0_78 = arith.constant 0 : index
    %199 = vector.load %arg6[%c1_76, %c0_77, %c0_78] : memref<2x1x64xf32, #tpu.memory_space<vmem>>, vector<1x1x64xf32>
    %200 = vector.shape_cast %199 : vector<1x1x64xf32> to vector<1x64xf32>
    %201 = arith.mulf %198, %198 : vector<8x64xf32>
    %cst_79 = arith.constant dense<0.000000e+00> : vector<8xf32>
    %202 = vector.multi_reduction <add>, %201, %cst_79 [1] : vector<8x64xf32> to vector<8xf32>
    %203 = vector.shape_cast %202 : vector<8xf32> to vector<8x1xf32>
    %cst_80 = arith.constant 6.400000e+01 : f32
    %204 = vector.broadcast %cst_80 : f32 to vector<8x1xf32>
    %205 = arith.divf %203, %204 : vector<8x1xf32>
    %cst_81 = arith.constant 9.99999997E-7 : f32
    %206 = vector.broadcast %cst_81 : f32 to vector<8x1xf32>
    %207 = arith.addf %205, %206 : vector<8x1xf32>
    %208 = math.rsqrt %207 : vector<8x1xf32>
    %209 = vector.broadcast %208 : vector<8x1xf32> to vector<8x64xf32>
    %210 = arith.mulf %198, %209 : vector<8x64xf32>
    %211 = vector.broadcast %200 : vector<1x64xf32> to vector<8x64xf32>
    %212 = arith.mulf %210, %211 : vector<8x64xf32>
    %c1_82 = arith.constant 1 : index
    %c0_83 = arith.constant 0 : index
    %c0_84 = arith.constant 0 : index
    %213 = vector.load %arg10[%c1_82, %c0_83, %c0_84] : memref<2x64x256xbf16, #tpu.memory_space<vmem>>, vector<1x64x256xbf16>
    %214 = vector.shape_cast %213 : vector<1x64x256xbf16> to vector<64x256xbf16>
    %215 = arith.truncf %212 : vector<8x64xf32> to vector<8x64xbf16>
    %cst_85 = arith.constant dense<0.000000e+00> : vector<8x256xf32>
    %216 = tpu.matmul %215, %214, %cst_85 {dimension_numbers = #tpu.dot_dimension_numbers<[1], [0], [0], [1], [0, 0, 1, 1], [], []>} : vector<8x64xbf16>, vector<64x256xbf16>, vector<8x256xf32> -> vector<8x256xf32>
    %217 = vector.extract_strided_slice %216 {offsets = [0, 0], sizes = [8, 128], strides = [1, 1]} : vector<8x256xf32> to vector<8x128xf32>
    %218 = vector.extract_strided_slice %216 {offsets = [0, 128], sizes = [8, 128], strides = [1, 1]} : vector<8x256xf32> to vector<8x128xf32>
    %219 = arith.negf %217 : vector<8x128xf32>
    %220 = math.exp %219 : vector<8x128xf32>
    %cst_86 = arith.constant 1.000000e+00 : f32
    %221 = vector.broadcast %cst_86 : f32 to vector<8x128xf32>
    %222 = arith.addf %221, %220 : vector<8x128xf32>
    %223 = arith.divf %221, %222 : vector<8x128xf32>
    %224 = arith.mulf %217, %223 : vector<8x128xf32>
    %225 = arith.mulf %224, %218 : vector<8x128xf32>
    %c1_87 = arith.constant 1 : index
    %c0_88 = arith.constant 0 : index
    %c0_89 = arith.constant 0 : index
    %226 = vector.load %arg11[%c1_87, %c0_88, %c0_89] : memref<2x128x64xbf16, #tpu.memory_space<vmem>>, vector<1x128x64xbf16>
    %227 = vector.shape_cast %226 : vector<1x128x64xbf16> to vector<128x64xbf16>
    %228 = arith.truncf %225 : vector<8x128xf32> to vector<8x128xbf16>
    %cst_90 = arith.constant dense<0.000000e+00> : vector<8x64xf32>
    %229 = tpu.matmul %228, %227, %cst_90 {dimension_numbers = #tpu.dot_dimension_numbers<[1], [0], [0], [1], [0, 0, 1, 1], [], []>} : vector<8x128xbf16>, vector<128x64xbf16>, vector<8x64xf32> -> vector<8x64xf32>
    %230 = arith.addf %229, %198 : vector<8x64xf32>
    %c0_91 = arith.constant 0 : index
    %c0_92 = arith.constant 0 : index
    %231 = vector.load %arg12[%c0_91, %c0_92] : memref<1x64xf32, #tpu.memory_space<vmem>>, vector<1x64xf32>
    %232 = arith.mulf %230, %230 : vector<8x64xf32>
    %cst_93 = arith.constant dense<0.000000e+00> : vector<8xf32>
    %233 = vector.multi_reduction <add>, %232, %cst_93 [1] : vector<8x64xf32> to vector<8xf32>
    %234 = vector.shape_cast %233 : vector<8xf32> to vector<8x1xf32>
    %cst_94 = arith.constant 6.400000e+01 : f32
    %235 = vector.broadcast %cst_94 : f32 to vector<8x1xf32>
    %236 = arith.divf %234, %235 : vector<8x1xf32>
    %cst_95 = arith.constant 9.99999997E-7 : f32
    %237 = vector.broadcast %cst_95 : f32 to vector<8x1xf32>
    %238 = arith.addf %236, %237 : vector<8x1xf32>
    %239 = math.rsqrt %238 : vector<8x1xf32>
    %240 = vector.broadcast %239 : vector<8x1xf32> to vector<8x64xf32>
    %241 = arith.mulf %230, %240 : vector<8x64xf32>
    %242 = vector.broadcast %231 : vector<1x64xf32> to vector<8x64xf32>
    %243 = arith.mulf %241, %242 : vector<8x64xf32>
    %c0_96 = arith.constant 0 : index
    %c0_97 = arith.constant 0 : index
    %c0_98 = arith.constant 0 : index
    %244 = vector.load %arg13[%c0_96, %c0_97, %c0_98] : memref<1x8x64xf32, #tpu.memory_space<vmem>>, vector<1x8x64xf32>
    %245 = vector.shape_cast %244 : vector<1x8x64xf32> to vector<8x64xf32>
    %246 = vector.shape_cast %243 : vector<8x64xf32> to vector<1x8x64xf32>
    tpu.vector_store %arg13[%c0_96, %c0_97, %c0_98], %246 {strides = array<i32>} : memref<1x8x64xf32, #tpu.memory_space<vmem>>, vector<1x8x64xf32>,
    return
  }
  func.func @transform_0(%arg0: i32) -> (i32, i32, i32) {
    %c0_i32 = arith.constant 0 : i32
    %c0_i32_0 = arith.constant 0 : i32
    %c0_i32_1 = arith.constant 0 : i32
    return %arg0, %c0_i32, %c0_i32_0 : i32, i32, i32
  }
  func.func @transform_1(%arg0: i32) -> (i32, i32, i32) {
    %c0_i32 = arith.constant 0 : i32
    %c0_i32_0 = arith.constant 0 : i32
    %c0_i32_1 = arith.constant 0 : i32
    return %arg0, %c0_i32, %c0_i32_0 : i32, i32, i32
  }
  func.func @transform_2(%arg0: i32) -> (i32, i32, i32) {
    %c0_i32 = arith.constant 0 : i32
    %c0_i32_0 = arith.constant 0 : i32
    %c0_i32_1 = arith.constant 0 : i32
    return %arg0, %c0_i32, %c0_i32_0 : i32, i32, i32
  }
  func.func @transform_3(%arg0: i32) -> (i32, i32) {
    %c0_i32 = arith.constant 0 : i32
    %c0_i32_0 = arith.constant 0 : i32
    %c0_i32_1 = arith.constant 0 : i32
    return %c0_i32, %c0_i32_0 : i32, i32
  }
  func.func @transform_4(%arg0: i32) -> (i32, i32, i32) {
    %c0_i32 = arith.constant 0 : i32
    %c0_i32_0 = arith.constant 0 : i32
    %c0_i32_1 = arith.constant 0 : i32
    %c0_i32_2 = arith.constant 0 : i32
    return %c0_i32, %c0_i32_0, %c0_i32_1 : i32, i32, i32
  }
  func.func @transform_5(%arg0: i32) -> (i32, i32, i32) {
    %c0_i32 = arith.constant 0 : i32
    %c0_i32_0 = arith.constant 0 : i32
    %c0_i32_1 = arith.constant 0 : i32
    %c0_i32_2 = arith.constant 0 : i32
    return %c0_i32, %c0_i32_0, %c0_i32_1 : i32, i32, i32
  }
  func.func @transform_6(%arg0: i32) -> (i32, i32, i32) {
    %c0_i32 = arith.constant 0 : i32
    %c0_i32_0 = arith.constant 0 : i32
    %c0_i32_1 = arith.constant 0 : i32
    %c0_i32_2 = arith.constant 0 : i32
    return %c0_i32, %c0_i32_0, %c0_i32_1 : i32, i32, i32
  }
  func.func @transform_7(%arg0: i32) -> (i32, i32, i32) {
    %c0_i32 = arith.constant 0 : i32
    %c0_i32_0 = arith.constant 0 : i32
    %c0_i32_1 = arith.constant 0 : i32
    %c0_i32_2 = arith.constant 0 : i32
    return %c0_i32, %c0_i32_0, %c0_i32_1 : i32, i32, i32
  }
  func.func @transform_8(%arg0: i32) -> (i32, i32, i32) {
    %c0_i32 = arith.constant 0 : i32
    %c0_i32_0 = arith.constant 0 : i32
    %c0_i32_1 = arith.constant 0 : i32
    %c0_i32_2 = arith.constant 0 : i32
    return %c0_i32, %c0_i32_0, %c0_i32_1 : i32, i32, i32
  }
  func.func @transform_9(%arg0: i32) -> (i32, i32, i32) {
    %c0_i32 = arith.constant 0 : i32
    %c0_i32_0 = arith.constant 0 : i32
    %c0_i32_1 = arith.constant 0 : i32
    %c0_i32_2 = arith.constant 0 : i32
    return %c0_i32, %c0_i32_0, %c0_i32_1 : i32, i32, i32
  }
  func.func @transform_10(%arg0: i32) -> (i32, i32, i32) {
    %c0_i32 = arith.constant 0 : i32
    %c0_i32_0 = arith.constant 0 : i32
    %c0_i32_1 = arith.constant 0 : i32
    %c0_i32_2 = arith.constant 0 : i32
    return %c0_i32, %c0_i32_0, %c0_i32_1 : i32, i32, i32
  }
  func.func @transform_11(%arg0: i32) -> (i32, i32) {
    %c0_i32 = arith.constant 0 : i32
    %c0_i32_0 = arith.constant 0 : i32
    %c0_i32_1 = arith.constant 0 : i32
    return %c0_i32, %c0_i32_0 : i32, i32
  }
  func.func @transform_12(%arg0: i32) -> (i32, i32, i32) {
    %c0_i32 = arith.constant 0 : i32
    %c0_i32_0 = arith.constant 0 : i32
    %c0_i32_1 = arith.constant 0 : i32
    return %arg0, %c0_i32, %c0_i32_0 : i32, i32, i32
  }
}

</mosaic_0001>

<bundles_post_ra>
// kernel: tile.14
= control target key start
LH: loop header
LB: loop body
LE: loop exit
PB: predicated region body
PF: predicated region fallthrough
CT: control target
= control target key end

     0   :  { %vm82_vm0 = vcmask 1047556   ;;  %vm84_vm1 = vcmask 261120   ;;  %s172_s9 = smov 32   ;;  %vm103_vm2 = vcmask 785920   ;;  %vm124_vm3 = vcmask 523520   ;;  %s257_s0 = inlined_call_operand.vmem [shape: f32[2,8,3,32], index: 0, kind: input, shape index: {}]   ;;  %s258_s1 = inlined_call_operand.vmem [shape: f32[2,8,96], index: 1, kind: output, shape index: {}]  }
   0x1   :  { %v159_v0 = vld [vmem:[%s257_s0 + $0x1c] sm:$0xf]  ;;  %v160_v1 = vld [vmem:[%s257_s0 + $0x18] sm:$0xf]  ;;  %v161_v2 = vld [vmem:[%s257_s0 + $0x14] sm:$0xf] }
   0x2   :  { %48 = vst [vmem:[#allocation0 + $0x38] sm:$0xf] %v159_v0  ;;  %53 = vst [vmem:[#allocation0 + $0x30] sm:$0xf] %v160_v1  ;;  %v162_v3 = vld [vmem:[%s257_s0 + $0x10] sm:$0xf] }
   0x3   :  { %58 = vst [vmem:[#allocation0 + $0x28] sm:$0xf] %v161_v2  ;;  %v163_v4 = vld [vmem:[%s257_s0 + $0xc] sm:$0xf]  ;;  %v164_v5 = vld [vmem:[%s257_s0 + $0x8] sm:$0xf] }
   0x4   :  { %63 = vst [vmem:[#allocation0 + $0x20] sm:$0xf] %v162_v3  ;;  %68 = vst [vmem:[#allocation0 + $0x18] sm:$0xf] %v163_v4  ;;  %v165_v6 = vld [vmem:[%s257_s0 + $0x4] sm:$0xf] }
   0x5   :  { %73 = vst [vmem:[#allocation0 + $0x10] sm:$0xf] %v164_v5  ;;  %v78_v7 = vld [vmem:[%s257_s0] sm:$0xf]  ;;  %77 = vst [vmem:[#allocation0 + $0x8] sm:$0xf] %v165_v6 }
   0x6   :  { %79 = vst [vmem:[#allocation0] sm:$0xf] %v78_v7  ;;  %v151_v8 = vld [vmem:[%s257_s0 + $0x3c] sm:$0xf]  ;;  %v152_v9 = vld [vmem:[%s257_s0 + $0x38] sm:$0xf] }
   0x7   :  { %8 = vst [vmem:[#allocation0 + $0x78] sm:$0xf] %v151_v8  ;;  %13 = vst [vmem:[#allocation0 + $0x70] sm:$0xf] %v152_v9  ;;  %v153_v10 = vld [vmem:[%s257_s0 + $0x34] sm:$0xf] }
   0x8   :  { %v154_v11 = vld [vmem:[%s257_s0 + $0x30] sm:$0xf]  ;;  %v155_v12 = vld [vmem:[%s257_s0 + $0x2c] sm:$0xf]  ;;  %18 = vst [vmem:[#allocation0 + $0x68] sm:$0xf] %v153_v10 }
   0x9   :  { %23 = vst [vmem:[#allocation0 + $0x60] sm:$0xf] %v154_v11  ;;  %28 = vst [vmem:[#allocation0 + $0x58] sm:$0xf] %v155_v12  ;;  %v156_v13 = vld [vmem:[%s257_s0 + $0x28] sm:$0xf] }
   0xa   :  { %v157_v14 = vld [vmem:[%s257_s0 + $0x24] sm:$0xf]  ;;  %v158_v15 = vld [vmem:[%s257_s0 + $0x20] sm:$0xf]  ;;  %33 = vst [vmem:[#allocation0 + $0x50] sm:$0xf] %v156_v13 }
   0xb   :  { %38 = vst [vmem:[#allocation0 + $0x48] sm:$0xf] %v157_v14  ;;  %43 = vst [vmem:[#allocation0 + $0x40] sm:$0xf] %v158_v15  ;;  %s171_s0 = smov 64  }
   0xc   :  { %v98_v16 = vld [vmem:[#allocation0 + $0x2] ss:$8 sm:$0xf0]   ;;  %v119_v17 = vld [vmem:[#allocation0 + $0x1] ss:$8 sm:$0xf0]  }
   0xd   :  { %v96_v18 = vld [vmem:[#allocation0 + $0x2] ss:$8 sm:$0xf]   ;;  %v117_v19 = vld [vmem:[#allocation0 + $0x1] ss:$8 sm:$0xf]  }
   0xe   :  { %v100_v20 = vsel %vm82_vm0, %v98_v16, %v96_v18  ;;  %v121_v21 = vsel %vm82_vm0, %v119_v17, %v117_v19  ;;  %v80_v22 = vld [vmem:[#allocation0] ss:$8 sm:$0xf]  }
   0xf   :  { %v81_v23 = vld [vmem:[#allocation0] ss:$8 sm:$0xf0]   ;;  %101 = vrot.lane.b32.xlu0 %v100_v20, %s171_s0  ;;  %122 = vrot.lane.b32.xlu1 %v121_v21, %s172_s9 }
  0x10   :  { %v108_v24 = vld [vmem:[#allocation0 + $0x42] ss:$8 sm:$0xf0]   ;;  %v129_v25 = vld [vmem:[#allocation0 + $0x41] ss:$8 sm:$0xf0]   ;;  %v83_v26 = vsel %vm82_vm0, %v81_v23, %v80_v22 }
  0x11   :  { %85 = vst.msk [vmem:[%s258_s1] sm:$0xff] %vm84_vm1, %v83_v26   ;;  %v89_v32 = vld [vmem:[#allocation0 + $0x40] ss:$8 sm:$0xf0]  }
  0x12   :  { %v106_v27 = vld [vmem:[#allocation0 + $0x42] ss:$8 sm:$0xf]   ;;  %v127_v28 = vld [vmem:[#allocation0 + $0x41] ss:$8 sm:$0xf]  }
  0x13   :  { %v110_v29 = vsel %vm82_vm0, %v108_v24, %v106_v27  ;;  %v131_v30 = vsel %vm82_vm0, %v129_v25, %v127_v28  ;;  %v87_v31 = vld [vmem:[#allocation0 + $0x40] ss:$8 sm:$0xf]  }
  0x14   :  { %v91_v33 = vsel %vm82_vm0, %v89_v32, %v87_v31  ;;  %111 = vrot.lane.b32.xlu0 %v110_v29, %s171_s0  ;;  %132 = vrot.lane.b32.xlu1 %v131_v30, %s172_s9 }
  0x15   :  { %166 = vst.msk [vmem:[%s258_s1 + $0x8] sm:$0xff] %vm84_vm1, %v91_v33  }
  0x81   :  { %v102_v34 = vpop.permute.xlu0 %101   ;;  %v123_v35 = vpop.permute.xlu1 %122  }
  0x82   :  { %104 = vst.msk [vmem:[%s258_s1] sm:$0xff] %vm103_vm2, %v102_v34  }
  0x83   :  { %125 = vst.msk [vmem:[%s258_s1] sm:$0xff] %vm124_vm3, %v123_v35  }
  0x86   :  { %v112_v36 = vpop.permute.xlu0 %111   ;;  %v133_v37 = vpop.permute.xlu1 %132  }
  0x87   :  { %167 = vst.msk [vmem:[%s258_s1 + $0x8] sm:$0xff] %vm103_vm2, %v112_v36  }
  0x88   :  { %168 = vst.msk [vmem:[%s258_s1 + $0x8] sm:$0xff] %vm124_vm3, %v133_v37  }

// kernel: qwen2_forward.1
= control target key start
LH: loop header
LB: loop body
LE: loop exit
PB: predicated region body
PF: predicated region fallthrough
CT: control target
= control target key end

     0   :  { %17 = vsyncpa [#allocation3], 0  ;;  %s3002_s0 = inlined_call_operand.vmem [shape: s32[2,8,1], index: 0, kind: input, shape index: {}]   ;;  %s3003_s1 = inlined_call_operand.vmem [shape: f32[2,8,96], index: 1, kind: input, shape index: {}]   ;;  %s3004_s2 = inlined_call_operand.vmem [shape: f32[2,8,96], index: 2, kind: input, shape index: {}]   ;;  %s3005_s3 = inlined_call_operand.vmem [shape: f32[128,64], index: 3, kind: input, shape index: {}]   ;;  %s3006_s4 = inlined_call_operand.vmem [shape: f32[2,1,64], index: 4, kind: input, shape index: {}]   ;;  %s3007_s5 = inlined_call_operand.vmem [shape: f32[2,1,64], index: 5, kind: input, shape index: {}]   ;;  %s3008_s6 = inlined_call_operand.vmem [shape: bf16[2,64,128], index: 6, kind: input, shape index: {}]   ;;  %s3009_s7 = inlined_call_operand.vmem [shape: f32[2,1,128], index: 7, kind: input, shape index: {}]   ;;  %s3010_s8 = inlined_call_operand.vmem [shape: bf16[2,64,64], index: 8, kind: input, shape index: {}]   ;;  %s3011_s9 = inlined_call_operand.vmem [shape: bf16[2,64,256], index: 9, kind: input, shape index: {}]   ;;  %s3012_s10 = inlined_call_operand.vmem [shape: bf16[2,128,64], index: 10, kind: input, shape index: {}]   ;;  %s3013_s11 = inlined_call_operand.vmem [shape: f32[1,64], index: 11, kind: input, shape index: {}]   ;;  %s3014_s12 = inlined_call_operand.hbm [shape: f32[2,8,64], index: 12, kind: output, shape index: {}]  }
   0x1   :  { %19 = vsyncpa [#allocation3 + $0x1], 0  ;;  %s2509_s21 = smov 0   ;;  %s2511_s22 = smov 0  }
   0x2   :  { %s2513_s23 = smov 0   ;;  %s2515_s24 = smov 0  }
   0x3 LB: > { %3021 = sst [smem:[#allocation5_spill]] %s2426_s23  ;;  %s2530_s25 = sadd.s32 4294967295, %s2430_s24   ;;  %s2430_s24 = sphi %s2515_s24, %s3029_s24   ;;  %s2426_s23 = sphi %s2513_s23, %s3031_s23   ;;  %s2422_s22 = sphi %s2511_s22, %s3033_s22   ;;  %s2418_s21 = sphi %s2509_s21, %s3032_s21  }
   0x4   : > { %s1857_s26 = sadd.s32 4294967294, %s2430_s24   ;;  %s2534_s27 = sadd.s32 1, %s2430_s24  }
   0x5   : > { %3022 = sst [smem:[#allocation6_spill]] %s2534_s27  ;;  %s299_s28 = sadd.s32 1, %s2426_s23 }
   0x6   : > { %s296_s29 = ssub.s32 %s2430_s24, %s2534_s27  ;;  %p309_p0 = scmp.ne.s32.totalorder %s2426_s23, %s2422_s22 }
   0x7   : > { %p297_p1 = scmp.eq.s32.totalorder %s296_s29, 0  ;;  %p310_p2 = scmp.eq.s32.totalorder %s2530_s25, 1 }
   0x8   : > { %p315_p3 = scmp.ne.s32.totalorder %s2422_s22, %s2418_s21  ;;  %p316_p4 = scmp.eq.s32.totalorder %s1857_s26, 1 }
   0x9   : > { %s2545_s30 = scalar_select %p297_p1, %s2426_s23, %s299_s28  }
   0xa   : > { %p2547_p5 = por %p310_p2, %p309_p0  ;;  %p2551_p6 = por %p316_p4, %p315_p3 }
   0xb   : > { %3023 = sst [smem:[#allocation7_spill]] %s2545_s30  ;;  %p1860_p7 = scmp.ge.s32.totalorder %s2430_s24, 1 }
   0xc   : > { %p382_p8 = scmp.lt.s32.totalorder %s2430_s24, 3 }
   0xe   : > { %p383_p9 = pnand %p1860_p7, %p382_p8 }
   0xf   : > { %p431_p10 = scmp.lt.s32.totalorder (!%p383_p9), %s2530_s25, 1  ;;  %v453_v0 = vld [vmem:[%s3005_s3] sm:$0xff] (!%p383_p9)  ;;  %v454_v1 = vld [vmem:[%s3005_s3 + $0x8] sm:$0xff] (!%p383_p9)  ;;  %v455_v2 = vld [vmem:[%s3005_s3 + $0x10] sm:$0xff] (!%p383_p9)  ;;  %v2432_v3 = vmov (!%p383_p9), 0   ;;  %v2433_v4 = vmov (!%p383_p9), 0.0|0.0   ;;  %v445_v28 = vlaneseq (!%p383_p9) }
  0x10   : > { %386 = sbr.rel (%p383_p9) target bundleno = 4991 (0x137f), region = 68  ;;  %2277 = vset.pattern.permute.xlu0 (!%p383_p9), %v2432_v3  ;;  %2203 = vmatprep.subr.bf16.mxu0 (!%p383_p9), %v2433_v4  ;;  %v2204_v5 = vpack.c.bf16 (!%p383_p9), %v454_v1, %v453_v0  ;;  %v456_v6 = vld [vmem:[%s3005_s3 + $0x18] sm:$0xff] (!%p383_p9)  ;;  %v457_v8 = vld [vmem:[%s3005_s3 + $0x20] sm:$0xff] (!%p383_p9)  ;;  %v458_v9 = vld [vmem:[%s3005_s3 + $0x28] sm:$0xff] (!%p383_p9)  ;;  %vm2434_vm0 = vmmov (!%p383_p9), 0   ;;  %v2435_v14 = vmov (!%p383_p9), 0.0  }
  0x11   : > { %v2207_v7 = vpack.c.bf16 (!%p383_p9), %v456_v6, %v455_v2  ;;  %v459_v11 = vld [vmem:[%s3005_s3 + $0x30] sm:$0xff] (!%p383_p9)  ;;  %v460_v12 = vld [vmem:[%s3005_s3 + $0x38] sm:$0xff] (!%p383_p9)  ;;  %v2210_v13 = vpack.c.bf16 (!%p383_p9), %v458_v9, %v457_v8  ;;  %2080 = vmatprep.mubr.msk.f32.mxu0 (!%p383_p9), %vm2434_vm0, %v2435_v14  ;;  %2083 = vmatprep.subr.bf16.mxu1 (!%p383_p9), %v2435_v14  ;;  %v461_v15 = vld [vmem:[%s3005_s3 + $0x40] sm:$0xff] (!%p383_p9)  ;;  %v2621_v29 = vand.u32 (!%p383_p9), 127, %v445_v28  ;;  %v2436_v31 = vmov (!%p383_p9), 1.0   ;;  %s2437_s19 = smov (!%p383_p9), 112  }
  0x12   : > { %2205 = vmatpush3.bf16.msra.mxu0 (!%p383_p9), %v2204_v5  ;;  %2091 = vmatprep.mubr.msk.bf16.mxu1 (!%p383_p9), %vm2434_vm0, %v2435_v14  ;;  %v462_v16 = vld [vmem:[%s3005_s3 + $0x48] sm:$0xff] (!%p383_p9)  ;;  %v2213_v17 = vpack.c.bf16 (!%p383_p9), %v460_v12, %v459_v11  ;;  %v463_v18 = vld [vmem:[%s3005_s3 + $0x50] sm:$0xff] (!%p383_p9)  ;;  %v464_v19 = vld [vmem:[%s3005_s3 + $0x58] sm:$0xff] (!%p383_p9)  ;;  %vm552_vm2 = vcmask (!%p383_p9), 523264   ;;  %s2438_s20 = smov (!%p383_p9), 16   ;;  %vm660_vm3 = vcmask (!%p383_p9), 130048  }
  0x13   : > { %2206 = vmatprep.subr.bf16.mxu0 (!%p383_p9), %v2433_v4  ;;  %v2216_v20 = vpack.c.bf16 (!%p383_p9), %v462_v16, %v461_v15  ;;  %v465_v21 = vld [vmem:[%s3005_s3 + $0x60] sm:$0xff] (!%p383_p9)  ;;  %v466_v22 = vld [vmem:[%s3005_s3 + $0x68] sm:$0xff] (!%p383_p9)  ;;  %v2219_v23 = vpack.c.bf16 (!%p383_p9), %v464_v19, %v463_v18  ;;  %v467_v24 = vld [vmem:[%s3005_s3 + $0x70] sm:$0xff] (!%p383_p9)  ;;  %vm662_vm4 = vcmask (!%p383_p9), 261120   ;;  %vm664_vm5 = vcmask (!%p383_p9), 392192   ;;  %s3019_s16 = smov (!%p383_p9), 96  }
  0x14   : > { %v468_v25 = vld [vmem:[%s3005_s3 + $0x78] sm:$0xff] (!%p383_p9)  ;;  %v2222_v26 = vpack.c.bf16 (!%p383_p9), %v466_v22, %v465_v21  ;;  %v2278_v36 = vld [vmem:[%s3008_s6] sm:$0xff] (!%p383_p9)   ;;  %v2279_v37 = vld [vmem:[%s3008_s6 + $0x8] sm:$0xff] (!%p383_p9)   ;;  %vm667_vm6 = vcmask (!%p383_p9), 654336   ;;  %v542_v9 = vshrl.u32 (!%p383_p9), %v445_v28, 7  ;;  %vm736_vm9 = vcmask (!%p383_p9), 64512  }
  0x15   : > { %v2225_v27 = vpack.c.bf16 (!%p383_p9), %v468_v25, %v467_v24  ;;  %2084 = vmatpush3.bf16.msra.mxu1 (!%p383_p9), %v2278_v36  ;;  %v2280_v38 = vld [vmem:[%s3008_s6 + $0x10] sm:$0xff] (!%p383_p9)   ;;  %v2281_v39 = vld [vmem:[%s3008_s6 + $0x18] sm:$0xff] (!%p383_p9)   ;;  %v1867_v44 = vld [vmem:[%s3006_s4] ss:$0 sm:$0xff] (!%p383_p9)  ;;  %s3018_s17 = smov (!%p383_p9), 32   ;;  %vm767_vm10 = vcmask (!%p383_p9), 1043456  }
  0x16   : > { %2208 = vmatpush3.bf16.msra.mxu0 (!%p383_p9), %v2207_v7  ;;  %2085 = vmatprep.subr.bf16.mxu1 (!%p383_p9), %v2435_v14  ;;  %v1868_v48 = vld [vmem:[%s3009_s7] ss:$0 sm:$0xff] (!%p383_p9)  ;;  %v544_v11 = vand.u32 (!%p383_p9), 7, %v542_v9  ;;  %s428_s23 = sand.u32 (!%p383_p9), 1, %s2422_s22  }
  0x17   : > { %s432_s29 = scalar_select %p431_p10, %s2530_s25, 1  ;;  %2209 = vmatprep.subr.bf16.mxu0 %v2433_v4 }
  0x18   : > { %vm546_vm7 = vcmp.ge.s32.totalorder %v544_v11, %v2621_v29  ;;  %v2292_v11 = vld [vmem:[%s3011_s9 + $0x20] ss:$8 sps:$4 sm:$0xff]   ;;  %s1861_s30 = sshll.u32 %s428_s23, 3  ;;  %s1761_s28 = scalar_lea.sflag [#allocation3], %s428_s23 }
  0x19   : > { %s2572_s15 = sshll.u32 %s432_s29, 3  ;;  %2086 = vmatpush3.bf16.msra.mxu1 %v2279_v37  ;;  %v2283_v37 = vld [vmem:[%s3010_s8 + $0x10] sm:$0xff]  }
  0x1a   : > { %s434_s26 = scalar_lea.vmem %s3002_s0, %s2572_s15  ;;  %2211 = vmatpush3.bf16.msra.mxu0 %v2210_v13  ;;  %2087 = vmatprep.subr.bf16.mxu1 %v2435_v14  ;;  %s438_s29 = scalar_lea.vmem %s3003_s1, %s2572_s15  ;;  %v2441_v13 = vmov -1e+30  }
  0x1b   : > { %v444_v10 = vld [vmem:[%s434_s26] sm:$0xff]  ;;  %2212 = vmatprep.subr.bf16.mxu0 %v2433_v4  ;;  %s442_s27 = scalar_lea.vmem %s3004_s2, %s2572_s15  ;;  %s3020_s15 = smov 64   ;;  %v2693_v15 = vsel %vm546_vm7, 0.0, %v2441_v13 }
  0x1c   : > { %448 = vperm.xlu0 %2277, %v444_v10   ;;  %v2673_v59 = vld [vmem:[%s438_s29] sm:$0xff]  ;;  %v543_v10 = vadd.s32 8, %v542_v9  ;;  %v2289_v9 = vld [vmem:[%s3011_s9 + $0x10] ss:$8 sps:$4 sm:$0xff]  }
  0x1d   : > { %2088 = vmatpush3.bf16.msra.mxu1 %v2280_v38  ;;  %v2675_v60 = vld [vmem:[%s442_s27] sm:$0xff] }
  0x1e   : > { %2214 = vmatpush3.bf16.msra.mxu0 %v2213_v17  ;;  %2089 = vmatprep.subr.bf16.mxu1 %v2435_v14  ;;  %v545_v12 = vand.u32 7, %v543_v10  ;;  %v2294_v10 = vld [vmem:[%s3011_s9 + $0x24] ss:$8 sps:$4 sm:$0xff]  }
  0x1f   : > { %2215 = vmatprep.subr.bf16.mxu0 %v2433_v4 }
  0x20   : > { %vm547_vm8 = vcmp.ge.s32.totalorder %v545_v12, %v2621_v29  ;;  %v2295_v12 = vld [vmem:[%s3011_s9 + $0x30] ss:$8 sps:$4 sm:$0xff]  }
  0x21   : > { %2090 = vmatpush3.bf16.msra.mxu1 %v2281_v39  ;;  %v2695_v17 = vsel %vm547_vm8, 0.0, %v2441_v13  ;;  %v2297_v13 = vld [vmem:[%s3011_s9 + $0x34] ss:$8 sps:$4 sm:$0xff]  }
  0x22   : > { %2217 = vmatpush3.bf16.msra.mxu0 %v2216_v20  ;;  %2101 = vmatprep.subr.bf16.mxu1 %v2435_v14 }
  0x23   : > { %2218 = vmatprep.subr.bf16.mxu0 %v2433_v4 }
  0x26   : > { %2220 = vmatpush3.bf16.msra.mxu0 %v2219_v23 }
  0x27   : > { %2221 = vmatprep.subr.bf16.mxu0 %v2433_v4 }
  0x2a   : > { %2223 = vmatpush3.bf16.msra.mxu0 %v2222_v26 }
  0x2b   : > { %2224 = vmatprep.subr.bf16.mxu0 %v2433_v4 }
  0x2e   : > { %2226 = vmatpush3.bf16.msra.mxu0 %v2225_v27 }
  0x2f   : > { %2095 = vmatprep.subr.bf16.mxu0 %v2435_v14 }
  0x9b   : > { %v449_v30 = vpop.permute.xlu0 %448 }
  0x9c   : > { %vm450_vm1 = vcmp.eq.s32.totalorder %v449_v30, %v2621_v29 }
  0x9d   : > { %2081 = vmatmul.mubr.msk.f32.vlgmr.msra.gmra.mrb[0].mxu0 %vm450_vm1, %v2436_v31 }
  0x9e   : > { %2097 = vmatprep.mubr.msk.bf16.mxu0 %vm2434_vm0, %v2435_v14 }
 0x170   : > { %v2626_v32 = vpop.f32.mrb[0].mxu0 }
 0x171   : > { %v2082_v33 = vpop.f32.mrb[1].mxu0  ;;  %v551_v34 = vmul.f32 %v2626_v32, %v2626_v32 }
 0x173   : > { %v553_v35 = vsel %vm552_vm2, %v551_v34, 0.0 }
 0x174   : > { %554 = vadd.xlane.f32.xlu0 %v553_v35 }
 0x201   : > { %v555_v40 = vpop.xlane.xlu0 %554 }
 0x202   : > { %v557_v41 = vmul.f32 0.015625, %v555_v40 }
 0x204   : > { %v558_v42 = vadd.f32 1e-06, %v557_v41 }
 0x206   : > { %2334 = vrsqrt.f32 %v558_v42 }
 0x210   : > { %v2335_v43 = vpop.eup %2334 }
 0x211   : > { %v560_v45 = vmul.f32 %v2335_v43, %v2626_v32 }
 0x213   : > { %v567_v46 = vmul.f32 %v1867_v44, %v560_v45 }
 0x215   : > { %v576_v47 = vpack.c.bf16 %v567_v46, %v567_v46  ;;  %v2282_v46 = vld [vmem:[%s3010_s8] sm:$0xff]  }
 0x217   : > { %2092 = vmatmul.mubr.msk.bf16.vlgmr.msra.gmra.mrb[0].mxu1 %vm552_vm2, %v576_v47 }
 0x218   : > { %2103 = vmatprep.mubr.msk.bf16.mxu1 %vm2434_vm0, %v2435_v14 }
 0x2ea   : > { %v645_v49 = vpop.f32.mrb[0].mxu1 }
 0x2eb   : > { %v2657_v50 = vadd.f32 %v1868_v48, %v645_v49  ;;  %v2093_v51 = vpop.f32.mrb[1].mxu1  ;;  %v2284_v48 = vld [vmem:[%s3010_s8 + $0x8] sm:$0xff]   ;;  %v2285_v49 = vld [vmem:[%s3010_s8 + $0x18] sm:$0xff]  }
 0x2ec   : > { %v648_v52 = vpop.f32.mrb[2].mxu1 }
 0x2ed   : > { %v2094_v53 = vpop.f32.mrb[3].mxu1  ;;  %v651_v54 = vsub.f32 0.0, %v2657_v50  ;;  %v669_v0 = vmul.f32 %v2657_v50, %v2673_v59  ;;  %v760_v36 = vpack.c.bf16 %v2657_v50, %v2657_v50 }
 0x2ef   : > { %653 = vrot.lane.b32.xlu1 %v651_v54, %s2437_s19 }
 0x2f3   : > { %657 = vrot.lane.b32.xlu1 %v2657_v50, %s2438_s20 }
 0x361   : > { %v654_v55 = vpop.permute.xlu1 %653 }
 0x365   : > { %v658_v56 = vpop.permute.xlu1 %657 }
 0x366   : > { %v661_v57 = vsel %vm660_vm3, %v654_v55, %v658_v56 }
 0x367   : > { %v663_v58 = vsel %vm662_vm4, %v661_v57, %v654_v55 }
 0x368   : > { %v665_v61 = vsel %vm664_vm5, %v663_v58, %v658_v56 }
 0x369   : > { %v666_v62 = vsel %vm552_vm2, %v665_v61, %v654_v55 }
 0x36a   : > { %v668_v63 = vsel %vm667_vm6, %v666_v62, %v658_v56 }
 0x36b   : > { %v670_v1 = vmul.f32 %v668_v63, %v2675_v60 }
 0x36d   : > { %v671_v2 = vadd.f32 %v670_v1, %v669_v0 }
 0x36f   : > { %v685_v4 = vpack.c.bf16 %v671_v2, %v671_v2 }
 0x371   : > { %687 = vrot.lane.b32.xlu1 %v685_v4, %s3020_s15  ;;  %s3028_s15 = smov 32  }
 0x375   : > { %681 = vrot.lane.b32.xlu1 %v671_v2, %s3019_s16 }
 0x3e3   : > { %v688_v5 = vpop.permute.xlu1 %687 }
 0x3e4   : > { %v693_v6 = vsel %vm662_vm4, %v688_v5, 0 }
 0x3e5   : > { %2096 = vmatpush3.bf16.xpose.msra.mxu0 %v693_v6 }
 0x3e6   : > { %2107 = vmatprep.subr.bf16.mxu0 %v2435_v14 }
 0x3e7   : > { %v682_v7 = vpop.permute.xlu1 %681 }
 0x3e8   : > { %v684_v8 = vpack.c.bf16 %v682_v7, %v671_v2  ;;  %v2288_v7 = vld [vmem:[%s3011_s9 + $0x4] ss:$8 sps:$4 sm:$0xff]  }
 0x3ec   : > { %2098 = vmatmul.mubr.msk.bf16.vlgmr.msra.gmra.mrb[4].mxu0 %vm662_vm4, %v684_v8  ;;  %v2286_v8 = vld [vmem:[%s3011_s9] ss:$8 sps:$4 sm:$0xff]  }
 0x3ed   : > { %2111 = vmatprep.mubr.msk.bf16.mxu0 %vm2434_vm0, %v2435_v14  ;;  %2108 = vmatpush3.bf16.msra.mxu0 %v2283_v37 }
 0x3ee   : > { %2109 = vmatprep.subr.bf16.mxu0 %v2435_v14 }
 0x3f1   : > { %2110 = vmatpush3.bf16.msra.mxu0 %v2285_v49 }
 0x3f2   : > { %993 = vmatprep.subr.bf16.mxu0 %v2288_v7 }
 0x4bf   : > { %v729_v16 = vpop.f32.mrb[4].mxu0 }
 0x4c0   : > { %v730_v18 = vadd.f32 %v729_v16, %v2693_v15  ;;  %v2099_v19 = vpop.f32.mrb[5].mxu0 }
 0x4c1   : > { %v732_v20 = vpop.f32.mrb[6].mxu0 }
 0x4c2   : > { %v733_v21 = vadd.f32 %v732_v20, %v2695_v17  ;;  %v2100_v22 = vpop.f32.mrb[7].mxu0  ;;  %v737_v23 = vsel %vm736_vm9, %v730_v18, -inf }
 0x4c3   : > { %738 = vmax.xlane.f32.xlu1 %v737_v23 }
 0x4c4   : > { %v740_v24 = vsel %vm736_vm9, %v733_v21, -inf }
 0x4c5   : > { %741 = vmax.xlane.f32.xlu0 %v740_v24 }
 0x550   : > { %v739_v25 = vpop.xlane.xlu1 %738 }
 0x551   : > { %v743_v26 = vsub.f32 %v730_v18, %v739_v25  ;;  %v2298_v25 = vld [vmem:[%s3012_s10] sm:$0xff]  }
 0x552   : > { %v742_v27 = vpop.xlane.xlu0 %741 }
 0x553   : > { %v745_v28 = vmul.f32 1.442695, %v743_v26  ;;  %v744_v29 = vsub.f32 %v733_v21, %v742_v27  ;;  %v1882_v21 = vld [vmem:[%s3007_s5] ss:$0 sm:$0xff]  ;;  %v2299_v26 = vld [vmem:[%s3012_s10 + $0x8] sm:$0xff]   ;;  %v2300_v27 = vld [vmem:[%s3012_s10 + $0x10] sm:$0xff]  }
 0x555   : > { %2336 = vpow2.f32 %v745_v28  ;;  %v747_v30 = vmul.f32 1.442695, %v744_v29  ;;  %v2301_v28 = vld [vmem:[%s3012_s10 + $0x18] sm:$0xff]   ;;  %v2302_v29 = vld [vmem:[%s3012_s10 + $0x20] sm:$0xff]  }
 0x557   : > { %2338 = vpow2.f32 %v747_v30  ;;  %v2303_v30 = vld [vmem:[%s3012_s10 + $0x28] sm:$0xff]  }
 0x55f   : > { %v2337_v31 = vpop.eup %2336 }
 0x560   : > { %v749_v33 = vsel %vm736_vm9, %v2337_v31, 0.0 }
 0x561   : > { %v2339_v34 = vpop.eup %2338  ;;  %750 = vadd.xlane.f32.xlu0 %v749_v33  ;;  %v2305_v33 = vld [vmem:[%s3012_s10 + $0x38] sm:$0xff]  }
 0x562   : > { %v752_v35 = vsel %vm736_vm9, %v2339_v34, 0.0 }
 0x565   : > { %753 = vadd.xlane.f32.xlu0 %v752_v35 }
 0x57b   : > { %762 = vrot.lane.b32.xlu0 %v760_v36, %s3018_s17 }
 0x5ee   : > { %v751_v38 = vpop.xlane.xlu0 %750 }
 0x5ef   : > { %2340 = vrcp.f32 %v751_v38 }
 0x5f2   : > { %v754_v39 = vpop.xlane.xlu0 %753 }
 0x5f3   : > { %2342 = vrcp.f32 %v754_v39 }
 0x5f6   : > { %v763_v40 = vpop.permute.xlu0 %762 }
 0x5f7   : > { %v769_v41 = vsel %vm767_vm10, %v763_v40, 0 }
 0x5f8   : > { %2102 = vmatpush3.bf16.msra.mxu1 %v769_v41 }
 0x5f9   : > { %2115 = vmatprep.subr.bf16.mxu1 %v2435_v14  ;;  %v2341_v42 = vpop.eup %2340 }
 0x5fa   : > { %v757_v44 = vmul.f32 %v2341_v42, %v2337_v31  ;;  %v2304_v31 = vld [vmem:[%s3012_s10 + $0x30] sm:$0xff]  }
 0x5fd   : > { %v2343_v43 = vpop.eup %2342 }
 0x5fe   : > { %v758_v45 = vmul.f32 %v2343_v43, %v2339_v34 }
 0x600   : > { %v759_v47 = vpack.c.bf16 %v758_v45, %v757_v44 }
 0x602   : > { %2104 = vmatmul.mubr.msk.bf16.vlgmr.msra.gmra.mrb[4].mxu1 %vm736_vm9, %v759_v47 }
 0x603   : > { %2116 = vmatpush3.bf16.msra.mxu1 %v2282_v46  ;;  %2119 = vmatprep.mubr.msk.bf16.mxu1 %vm2434_vm0, %v2435_v14 }
 0x604   : > { %2117 = vmatprep.subr.bf16.mxu1 %v2435_v14 }
 0x607   : > { %2118 = vmatpush3.bf16.msra.mxu1 %v2284_v48 }
 0x608   : > { %2123 = vmatprep.subr.bf16.mxu1 %v2435_v14 }
 0x6d5   : > { %v805_v50 = vpop.f32.mrb[4].mxu1 }
 0x6d6   : > { %v812_v51 = vpack.c.bf16 %v805_v50, %v805_v50  ;;  %v2105_v52 = vpop.f32.mrb[5].mxu1 }
 0x6d7   : > { %v808_v53 = vpop.f32.mrb[6].mxu1  ;;  %v2306_v52 = vld [vmem:[%s3008_s6 + $0x20] sm:$0xff]  }
 0x6d8   : > { %v813_v54 = vpack.c.bf16 %v808_v53, %v808_v53  ;;  %v2106_v55 = vpop.f32.mrb[7].mxu1  ;;  %2120 = vmatmul.mubr.msk.bf16.vlgmr.msra.gmra.mrb[8].mxu1 %vm662_vm4, %v812_v51  ;;  %v2307_v53 = vld [vmem:[%s3008_s6 + $0x28] sm:$0xff]  }
 0x6d9   : > { %2139 = vmatprep.mubr.msk.bf16.mxu1 %vm2434_vm0, %v2435_v14  ;;  %2124 = vmatpush3.bf16.msra.mxu1 %v2298_v25  ;;  %v2309_v55 = vld [vmem:[%s3008_s6 + $0x38] sm:$0xff]  }
 0x6da   : > { %2112 = vmatmul.mubr.msk.bf16.vlgmr.msra.gmra.mrb[8].mxu0 %vm662_vm4, %v813_v54  ;;  %2125 = vmatprep.subr.bf16.mxu1 %v2435_v14  ;;  %v2308_v54 = vld [vmem:[%s3008_s6 + $0x30] sm:$0xff]  }
 0x6db   : > { %1025 = vmatprep.mubr.bf16.mxu0 %v2432_v3  ;;  %994 = vmatpush1.bf16.msra.mxu0 %v2286_v8 }
 0x6dd   : > { %2126 = vmatpush3.bf16.msra.mxu1 %v2299_v26 }
 0x6de   : > { %2127 = vmatprep.subr.bf16.mxu1 %v2435_v14 }
 0x6e1   : > { %2128 = vmatpush3.bf16.msra.mxu1 %v2300_v27 }
 0x6e2   : > { %2129 = vmatprep.subr.bf16.mxu1 %v2435_v14 }
 0x6e5   : > { %2130 = vmatpush3.bf16.msra.mxu1 %v2301_v28 }
 0x6e6   : > { %2131 = vmatprep.subr.bf16.mxu1 %v2435_v14 }
 0x6e9   : > { %2132 = vmatpush3.bf16.msra.mxu1 %v2302_v29 }
 0x6ea   : > { %2133 = vmatprep.subr.bf16.mxu1 %v2435_v14 }
 0x6ed   : > { %2134 = vmatpush3.bf16.msra.mxu1 %v2303_v30 }
 0x6ee   : > { %2135 = vmatprep.subr.bf16.mxu1 %v2435_v14 }
 0x6f1   : > { %2136 = vmatpush3.bf16.msra.mxu1 %v2304_v31 }
 0x6f2   : > { %2137 = vmatprep.subr.bf16.mxu1 %v2435_v14 }
 0x6f5   : > { %2138 = vmatpush3.bf16.msra.mxu1 %v2305_v33 }
 0x6f6   : > { %2161 = vmatprep.subr.bf16.mxu1 %v2435_v14 }
 0x7ab   : > { %v918_v56 = vpop.f32.mrb[8].mxu1 }
 0x7ac   : > { %v2121_v57 = vpop.f32.mrb[9].mxu1 }
 0x7ad   : > { %v863_v58 = vpop.f32.mrb[8].mxu0  ;;  %v921_v61 = vpop.f32.mrb[10].mxu1 }
 0x7ae   : > { %v919_v62 = vadd.f32 %v918_v56, %v863_v58  ;;  %v2113_v63 = vpop.f32.mrb[9].mxu0  ;;  %v2122_v0 = vpop.f32.mrb[11].mxu1 }
 0x7af   : > { %v866_v1 = vpop.f32.mrb[10].mxu0 }
 0x7b0   : > { %v2732_v2 = vadd.f32 %v919_v62, %v2626_v32  ;;  %v2114_v4 = vpop.f32.mrb[11].mxu0  ;;  %v2291_v32 = vld [vmem:[%s3011_s9 + $0x14] ss:$8 sps:$4 sm:$0xff]   ;;  %v1902_v62 = vld [vmem:[%s3006_s4 + $0x1] ss:$0 sm:$0xff] }
 0x7b1   : > { %995 = vmatprep.subr.bf16.mxu0 %v2291_v32 }
 0x7b2   : > { %v926_v5 = vmul.f32 %v2732_v2, %v2732_v2  ;;  %996 = vmatpush1.bf16.msra.mxu0 %v2289_v9 }
 0x7b3   : > { %997 = vmatprep.subr.bf16.mxu0 %v2294_v10 }
 0x7b4   : > { %v927_v6 = vsel %vm552_vm2, %v926_v5, 0.0 }
 0x7b5   : > { %928 = vadd.xlane.f32.xlu1 %v927_v6 }
 0x7b6   : > { %998 = vmatpush1.bf16.msra.mxu0 %v2292_v11 }
 0x7b7   : > { %999 = vmatprep.subr.bf16.mxu0 %v2297_v13 }
 0x7ba   : > { %1000 = vmatpush1.bf16.msra.mxu0 %v2295_v12 }
 0x7bb   : > { %2143 = vmatprep.subr.bf16.mxu0 %v2435_v14 }
 0x842   : > { %v929_v16 = vpop.xlane.xlu1 %928 }
 0x843   : > { %v930_v18 = vmul.f32 0.015625, %v929_v16 }
 0x845   : > { %v931_v19 = vadd.f32 1e-06, %v930_v18 }
 0x847   : > { %2344 = vrsqrt.f32 %v931_v19 }
 0x851   : > { %v2345_v20 = vpop.eup %2344 }
 0x852   : > { %v933_v22 = vmul.f32 %v2345_v20, %v2732_v2 }
 0x854   : > { %v940_v23 = vmul.f32 %v1882_v21, %v933_v22 }
 0x856   : > { %v949_v24 = vpack.c.bf16 %v940_v23, %v940_v23 }
 0x858   : > { %1891 = vmatmul.mubr.msk.bf16.vlgmr.msra.gmra.mrb[12].mxu0 %vm552_vm2, %v949_v24 }
 0x859   : > { %2151 = vmatprep.mubr.msk.bf16.mxu0 %vm2434_vm0, %v2435_v14  ;;  %2144 = vmatpush3.bf16.msra.mxu0 %v2306_v52 }
 0x85a   : > { %2145 = vmatprep.subr.bf16.mxu0 %v2435_v14 }
 0x85d   : > { %2146 = vmatpush3.bf16.msra.mxu0 %v2307_v53  ;;  %v2310_v53 = vld [vmem:[%s3010_s8 + $0x20] sm:$0xff]  }
 0x85e   : > { %2147 = vmatprep.subr.bf16.mxu0 %v2435_v14 }
 0x861   : > { %2148 = vmatpush3.bf16.msra.mxu0 %v2308_v54 }
 0x862   : > { %2149 = vmatprep.subr.bf16.mxu0 %v2435_v14 }
 0x865   : > { %2150 = vmatpush3.bf16.msra.mxu0 %v2309_v55  ;;  %v2312_v55 = vld [vmem:[%s3010_s8 + $0x28] sm:$0xff]  }
 0x866   : > { %2155 = vmatprep.subr.bf16.mxu0 %v2435_v14 }
 0x92b   : > { %v1027_v34 = vpop.f32.mrb[12].mxu0 }
 0x92c   : > { %v1892_v35 = vmul.f32 -1.442695, %v1027_v34  ;;  %v1029_v36 = vpop.f32.mrb[13].mxu0 }
 0x92d   : > { %v1031_v37 = vpop.f32.mrb[14].mxu0 }
 0x92e   : > { %2346 = vpow2.f32 %v1892_v35  ;;  %v1032_v38 = vpop.f32.mrb[15].mxu0 }
 0x938   : > { %v2347_v39 = vpop.eup %2346 }
 0x939   : > { %v1037_v40 = vadd.f32 1.0, %v2347_v39 }
 0x93b   : > { %2348 = vrcp.f32 %v1037_v40 }
 0x945   : > { %v2349_v41 = vpop.eup %2348 }
 0x946   : > { %v1040_v42 = vmul.f32 %v2349_v41, %v1027_v34 }
 0x948   : > { %v1041_v43 = vmul.f32 %v1040_v42, %v1029_v36 }
 0x94a   : > { %v1058_v44 = vpack.c.bf16 %v1041_v43, %v1041_v43  ;;  %v2311_v43 = vld [vmem:[%s3010_s8 + $0x30] sm:$0xff]  }
 0x94c   : > { %2140 = vmatmul.mubr.bf16.vlgmr.msra.gmra.mrb[12].mxu1 %v1058_v44 }
 0x94d   : > { %2163 = vmatprep.mubr.msk.bf16.mxu1 %vm2434_vm0, %v2435_v14 }
 0xa1f   : > { %v1141_v45 = vpop.f32.mrb[12].mxu1 }
 0xa20   : > { %v2804_v46 = vadd.f32 %v1141_v45, %v2732_v2  ;;  %v2141_v47 = vpop.f32.mrb[13].mxu1  ;;  %v1912_v2 = vld [vmem:[%s3009_s7 + $0x1] ss:$0 sm:$0xff] }
 0xa21   : > { %v1144_v48 = vpop.f32.mrb[14].mxu1 }
 0xa22   : > { %v2142_v49 = vpop.f32.mrb[15].mxu1  ;;  %v1149_v50 = vmul.f32 %v2804_v46, %v2804_v46 }
 0xa24   : > { %v1150_v51 = vsel %vm552_vm2, %v1149_v50, 0.0 }
 0xa25   : > { %1151 = vadd.xlane.f32.xlu1 %v1150_v51 }
 0xab2   : > { %v1152_v56 = vpop.xlane.xlu1 %1151 }
 0xab3   : > { %v1153_v57 = vmul.f32 0.015625, %v1152_v56  ;;  %v2313_v56 = vld [vmem:[%s3010_s8 + $0x38] sm:$0xff]  }
 0xab5   : > { %v1154_v58 = vadd.f32 1e-06, %v1153_v57 }
 0xab7   : > { %2350 = vrsqrt.f32 %v1154_v58 }
 0xac1   : > { %v2351_v61 = vpop.eup %2350 }
 0xac2   : > { %v1156_v63 = vmul.f32 %v2351_v61, %v2804_v46 }
 0xac4   : > { %v1163_v0 = vmul.f32 %v1902_v62, %v1156_v63 }
 0xac6   : > { %v1173_v1 = vpack.c.bf16 %v1163_v0, %v1163_v0 }
 0xac8   : > { %2152 = vmatmul.mubr.msk.bf16.vlgmr.msra.gmra.mrb[16].mxu0 %vm552_vm2, %v1173_v1 }
 0xac9   : > { %2157 = vmatprep.mubr.msk.bf16.mxu0 %vm2434_vm0, %v2435_v14 }
 0xb9b   : > { %v1243_v4 = vpop.f32.mrb[16].mxu0 }
 0xb9c   : > { %v1244_v5 = vadd.f32 %v1912_v2, %v1243_v4  ;;  %v2153_v6 = vpop.f32.mrb[17].mxu0 }
 0xb9d   : > { %v1246_v7 = vpop.f32.mrb[18].mxu0 }
 0xb9e   : > { %1255 = vrot.lane.b32.xlu0 %v1244_v5, %s2438_s20  ;;  %v2154_v8 = vpop.f32.mrb[19].mxu0  ;;  %v1249_v32 = vsub.f32 0.0, %v1244_v5  ;;  %v1263_v19 = vmul.f32 %v1244_v5, %v2673_v59  ;;  %s3026_s20 = smov 64   ;;  %v1354_v42 = vpack.c.bf16 %v1244_v5, %v1244_v5 }
 0xba0   : > { %1251 = vrot.lane.b32.xlu1 %v1249_v32, %s2437_s19  ;;  %s3027_s19 = smov 96  }
 0xc10   : > { %v1256_v9 = vpop.permute.xlu0 %1255 }
 0xc12   : > { %v1252_v10 = vpop.permute.xlu1 %1251 }
 0xc13   : > { %v1258_v11 = vsel %vm660_vm3, %v1252_v10, %v1256_v9 }
 0xc14   : > { %v1259_v12 = vsel %vm662_vm4, %v1258_v11, %v1252_v10 }
 0xc15   : > { %v1260_v13 = vsel %vm664_vm5, %v1259_v12, %v1256_v9 }
 0xc16   : > { %v1261_v16 = vsel %vm552_vm2, %v1260_v13, %v1252_v10  ;;  %v2314_v13 = vld [vmem:[%s3011_s9 + $0x40] ss:$8 sps:$4 sm:$0xff]  }
 0xc17   : > { %v1262_v18 = vsel %vm667_vm6, %v1261_v16, %v1256_v9  ;;  %v2317_v16 = vld [vmem:[%s3011_s9 + $0x50] ss:$8 sps:$4 sm:$0xff]  }
 0xc18   : > { %v1264_v20 = vmul.f32 %v1262_v18, %v2675_v60  ;;  %v2322_v18 = vld [vmem:[%s3011_s9 + $0x64] ss:$8 sps:$4 sm:$0xff]  }
 0xc1a   : > { %v1265_v21 = vadd.f32 %v1264_v20, %v1263_v19  ;;  %v2320_v19 = vld [vmem:[%s3011_s9 + $0x60] ss:$8 sps:$4 sm:$0xff]   ;;  %v2323_v20 = vld [vmem:[%s3011_s9 + $0x70] ss:$8 sps:$4 sm:$0xff]  }
 0xc1c   : > { %v1280_v22 = vpack.c.bf16 %v1265_v21, %v1265_v21 }
 0xc1e   : > { %1282 = vrot.lane.b32.xlu0 %v1280_v22, %s3026_s20 }
 0xc22   : > { %1276 = vrot.lane.b32.xlu0 %v1265_v21, %s3027_s19  ;;  %s1980_s19 = sshll.u32 %s2530_s25, 7  ;;  %s2443_s25 = smov [#allocation2]  }
 0xc23   : > { %s2959_s26 = scalar_lea.hbm %s3014_s12, %s1980_s19 }
 0xc90   : > { %v1283_v23 = vpop.permute.xlu0 %1282 }
 0xc91   : > { %v1288_v24 = vsel %vm662_vm4, %v1283_v23, 0 }
 0xc92   : > { %2156 = vmatpush3.bf16.xpose.msra.mxu0 %v1288_v24 }
 0xc93   : > { %2167 = vmatprep.subr.bf16.mxu0 %v2435_v14 }
 0xc94   : > { %v1277_v25 = vpop.permute.xlu0 %1276 }
 0xc95   : > { %v1279_v26 = vpack.c.bf16 %v1277_v25, %v1265_v21  ;;  %v2325_v21 = vld [vmem:[%s3011_s9 + $0x74] ss:$8 sps:$4 sm:$0xff]  }
 0xc99   : > { %2158 = vmatmul.mubr.msk.bf16.vlgmr.msra.gmra.mrb[20].mxu0 %vm662_vm4, %v1279_v26  ;;  %v1935_v26 = vld [vmem:[%s3007_s5 + $0x1] ss:$0 sm:$0xff] }
 0xc9a   : > { %2171 = vmatprep.mubr.msk.bf16.mxu0 %vm2434_vm0, %v2435_v14  ;;  %2168 = vmatpush3.bf16.msra.mxu0 %v2311_v43 }
 0xc9b   : > { %2169 = vmatprep.subr.bf16.mxu0 %v2435_v14 }
 0xc9e   : > { %2170 = vmatpush3.bf16.msra.mxu0 %v2313_v56 }
 0xd6c   : > { %v1324_v59 = vpop.f32.mrb[20].mxu0 }
 0xd6d   : > { %v1325_v60 = vadd.f32 %v1324_v59, %v2693_v15  ;;  %v2159_v27 = vpop.f32.mrb[21].mxu0 }
 0xd6e   : > { %v1327_v28 = vpop.f32.mrb[22].mxu0 }
 0xd6f   : > { %v1328_v29 = vadd.f32 %v1327_v28, %v2695_v17  ;;  %v2160_v30 = vpop.f32.mrb[23].mxu0  ;;  %v1331_v31 = vsel %vm736_vm9, %v1325_v60, -inf  ;;  %v2326_v28 = vld [vmem:[%s3012_s10 + $0x40] sm:$0xff]  }
 0xd70   : > { %1332 = vmax.xlane.f32.xlu1 %v1331_v31  ;;  %v2328_v30 = vld [vmem:[%s3012_s10 + $0x50] sm:$0xff]   ;;  %v2329_v31 = vld [vmem:[%s3012_s10 + $0x58] sm:$0xff]  }
 0xd71   : > { %v1334_v33 = vsel %vm736_vm9, %v1328_v29, -inf }
 0xd72   : > { %1335 = vmax.xlane.f32.xlu0 %v1334_v33  ;;  %v2330_v33 = vld [vmem:[%s3012_s10 + $0x60] sm:$0xff]  }
 0xdfd   : > { %v1333_v34 = vpop.xlane.xlu1 %1332 }
 0xdfe   : > { %v1337_v35 = vsub.f32 %v1325_v60, %v1333_v34  ;;  %v2331_v34 = vld [vmem:[%s3012_s10 + $0x68] sm:$0xff]  }
 0xdff   : > { %v1336_v36 = vpop.xlane.xlu0 %1335 }
 0xe00   : > { %v1339_v37 = vmul.f32 1.442695, %v1337_v35  ;;  %v1338_v38 = vsub.f32 %v1328_v29, %v1336_v36  ;;  %v2327_v29 = vld [vmem:[%s3012_s10 + $0x48] sm:$0xff]   ;;  %v2332_v35 = vld [vmem:[%s3012_s10 + $0x70] sm:$0xff]   ;;  %v2333_v36 = vld [vmem:[%s3012_s10 + $0x78] sm:$0xff]  }
 0xe02   : > { %2352 = vpow2.f32 %v1339_v37  ;;  %v1341_v39 = vmul.f32 1.442695, %v1338_v38 }
 0xe04   : > { %2354 = vpow2.f32 %v1341_v39 }
 0xe0c   : > { %v2353_v15 = vpop.eup %2352 }
 0xe0d   : > { %v1343_v40 = vsel %vm736_vm9, %v2353_v15, 0.0 }
 0xe0e   : > { %v2355_v41 = vpop.eup %2354  ;;  %1344 = vadd.xlane.f32.xlu0 %v1343_v40 }
 0xe0f   : > { %v1346_v17 = vsel %vm736_vm9, %v2355_v41, 0.0 }
 0xe10   : > { %1347 = vadd.xlane.f32.xlu1 %v1346_v17 }
 0xe24   : > { %1356 = vrot.lane.b32.xlu0 %v1354_v42, %s3028_s15  ;;  %s430_s15 = scalar_lea.vmem [#allocation2], %s1861_s30  ;;  %s2372_s30 = sshll.u32 %s2443_s25, 4  ;;  %s2373_s30 = int_to_ptr.vmem [resolvable:$false] %s2372_s30 }
 0xe25   : > { %s1774_s16 = sshll.u32 %s430_s15, 4  ;;  %s2374_s27 = scalar_lea.vmem %s2373_s30, 256  ;;  %s2961_s16 = int_to_ptr.vmem [resolvable:$true] %s1774_s16 }
 0xe26   : > { %s2368_s29 = scalar_lea.vmem %s2961_s16, 128  ;;  %p2375_p0 = scmp.lt.s32.totalorder %s2961_s16, %s2373_s30 }
 0xe27   : > { %p2369_p11 = scmp.ne.s32.totalorder %s2961_s16, %s2368_s29  ;;  %p2376_p1 = scmp.lt.s32.totalorder %s2374_s27, %s2368_s29 }
 0xe29   : > { %p2370_p12 = pnand %p2369_p11, %p2547_p5  ;;  %p2377_p2 = por %p2376_p1, %p2375_p0 }
 0xe2b   : > { %p2371_p13 = pneg %p2370_p12 }
 0xe2d   : > { %p2378_p3 = pnand %p2377_p2, %p2371_p13 }
 0xe9b   : > { %v1345_v44 = vpop.xlane.xlu0 %1344 }
 0xe9c   : > { %2356 = vrcp.f32 %v1345_v44 }
 0xe9d   : > { %v1348_v45 = vpop.xlane.xlu1 %1347 }
 0xe9e   : > { %2358 = vrcp.f32 %v1348_v45 }
 0xe9f   : > { %v1357_v47 = vpop.permute.xlu0 %1356 }
 0xea0   : > { %v1362_v48 = vsel %vm767_vm10, %v1357_v47, 0 }
 0xea1   : > { %2162 = vmatpush3.bf16.msra.mxu1 %v1362_v48 }
 0xea2   : > { %2175 = vmatprep.subr.bf16.mxu1 %v2435_v14 }
 0xea6   : > { %v2357_v49 = vpop.eup %2356 }
 0xea7   : > { %v1351_v51 = vmul.f32 %v2357_v49, %v2353_v15 }
 0xea8   : > { %v2359_v50 = vpop.eup %2358 }
 0xea9   : > { %v1352_v52 = vmul.f32 %v2359_v50, %v2355_v41 }
 0xeab   : > { %v1353_v54 = vpack.c.bf16 %v1352_v52, %v1351_v51 }
 0xead   : > { %2164 = vmatmul.mubr.msk.bf16.vlgmr.msra.gmra.mrb[16].mxu1 %vm736_vm9, %v1353_v54 }
 0xeae   : > { %2176 = vmatpush3.bf16.msra.mxu1 %v2310_v53  ;;  %2179 = vmatprep.mubr.msk.bf16.mxu1 %vm2434_vm0, %v2435_v14 }
 0xeaf   : > { %2177 = vmatprep.subr.bf16.mxu1 %v2435_v14 }
 0xeb2   : > { %2178 = vmatpush3.bf16.msra.mxu1 %v2312_v55 }
 0xeb3   : > { %2183 = vmatprep.subr.bf16.mxu1 %v2435_v14 }
 0xf80   : > { %v1398_v57 = vpop.f32.mrb[16].mxu1 }
 0xf81   : > { %v1405_v58 = vpack.c.bf16 %v1398_v57, %v1398_v57  ;;  %v2165_v61 = vpop.f32.mrb[17].mxu1  ;;  %v1978_v57 = vld [vmem:[%s3013_s11] ss:$0 sm:$0xff] }
 0xf82   : > { %v1401_v62 = vpop.f32.mrb[18].mxu1 }
 0xf83   : > { %v1406_v63 = vpack.c.bf16 %v1401_v62, %v1401_v62  ;;  %v2166_v0 = vpop.f32.mrb[19].mxu1  ;;  %2180 = vmatmul.mubr.msk.bf16.vlgmr.msra.gmra.mrb[20].mxu1 %vm662_vm4, %v1405_v58 }
 0xf84   : > { %2199 = vmatprep.mubr.msk.bf16.mxu1 %vm2434_vm0, %v2435_v14  ;;  %2184 = vmatpush3.bf16.msra.mxu1 %v2326_v28 }
 0xf85   : > { %2172 = vmatmul.mubr.msk.bf16.vlgmr.msra.gmra.mrb[24].mxu0 %vm662_vm4, %v1406_v63  ;;  %2185 = vmatprep.subr.bf16.mxu1 %v2435_v14 }
 0xf86   : > { %1620 = vmatprep.mubr.bf16.mxu0 %v2432_v3  ;;  %v2316_v3 = vld [vmem:[%s3011_s9 + $0x44] ss:$8 sps:$4 sm:$0xff]  }
 0xf87   : > { %1588 = vmatprep.subr.bf16.mxu0 %v2316_v3 }
 0xf88   : > { %1589 = vmatpush1.bf16.msra.mxu0 %v2314_v13  ;;  %2186 = vmatpush3.bf16.msra.mxu1 %v2327_v29 }
 0xf89   : > { %2187 = vmatprep.subr.bf16.mxu1 %v2435_v14 }
 0xf8c   : > { %2188 = vmatpush3.bf16.msra.mxu1 %v2328_v30 }
 0xf8d   : > { %2189 = vmatprep.subr.bf16.mxu1 %v2435_v14 }
 0xf90   : > { %2190 = vmatpush3.bf16.msra.mxu1 %v2329_v31 }
 0xf91   : > { %2191 = vmatprep.subr.bf16.mxu1 %v2435_v14 }
 0xf94   : > { %2192 = vmatpush3.bf16.msra.mxu1 %v2330_v33 }
 0xf95   : > { %2193 = vmatprep.subr.bf16.mxu1 %v2435_v14 }
 0xf98   : > { %2194 = vmatpush3.bf16.msra.mxu1 %v2331_v34 }
 0xf99   : > { %2195 = vmatprep.subr.bf16.mxu1 %v2435_v14 }
 0xf9c   : > { %2196 = vmatpush3.bf16.msra.mxu1 %v2332_v35 }
 0xf9d   : > { %2197 = vmatprep.subr.bf16.mxu1 %v2435_v14 }
 0xfa0   : > { %2198 = vmatpush3.bf16.msra.mxu1 %v2333_v36 }
0x1056   : > { %v1511_v1 = vpop.f32.mrb[20].mxu1 }
0x1057   : > { %v2181_v2 = vpop.f32.mrb[21].mxu1 }
0x1058   : > { %v1456_v4 = vpop.f32.mrb[24].mxu0  ;;  %v1514_v5 = vpop.f32.mrb[22].mxu1 }
0x1059   : > { %v1512_v6 = vadd.f32 %v1511_v1, %v1456_v4  ;;  %v2173_v7 = vpop.f32.mrb[25].mxu0  ;;  %v2182_v8 = vpop.f32.mrb[23].mxu1 }
0x105a   : > { %v1459_v32 = vpop.f32.mrb[26].mxu0 }
0x105b   : > { %v2884_v9 = vadd.f32 %v1512_v6, %v2804_v46  ;;  %v2174_v10 = vpop.f32.mrb[27].mxu0  ;;  %v2319_v46 = vld [vmem:[%s3011_s9 + $0x54] ss:$8 sps:$4 sm:$0xff]  }
0x105c   : > { %1590 = vmatprep.subr.bf16.mxu0 %v2319_v46 }
0x105d   : > { %v1520_v11 = vmul.f32 %v2884_v9, %v2884_v9  ;;  %1591 = vmatpush1.bf16.msra.mxu0 %v2317_v16 }
0x105e   : > { %1592 = vmatprep.subr.bf16.mxu0 %v2322_v18 }
0x105f   : > { %v1521_v12 = vsel %vm552_vm2, %v1520_v11, 0.0 }
0x1060   : > { %1522 = vadd.xlane.f32.xlu1 %v1521_v12 }
0x1061   : > { %1593 = vmatpush1.bf16.msra.mxu0 %v2320_v19 }
0x1062   : > { %1594 = vmatprep.subr.bf16.mxu0 %v2325_v21 }
0x1065   : > { %1595 = vmatpush1.bf16.msra.mxu0 %v2323_v20 }
0x10ed   : > { %v1523_v22 = vpop.xlane.xlu1 %1522 }
0x10ee   : > { %v1524_v23 = vmul.f32 0.015625, %v1523_v22 }
0x10f0   : > { %v1525_v24 = vadd.f32 1e-06, %v1524_v23 }
0x10f2   : > { %2360 = vrsqrt.f32 %v1525_v24 }
0x10fc   : > { %v2361_v25 = vpop.eup %2360 }
0x10fd   : > { %v1527_v59 = vmul.f32 %v2361_v25, %v2884_v9 }
0x10ff   : > { %v1534_v60 = vmul.f32 %v1935_v26, %v1527_v59 }
0x1101   : > { %v1544_v27 = vpack.c.bf16 %v1534_v60, %v1534_v60 }
0x1103   : > { %1952 = vmatmul.mubr.msk.bf16.vlgmr.msra.gmra.mrb[28].mxu0 %vm552_vm2, %v1544_v27 }
0x11d6   : > { %v1622_v37 = vpop.f32.mrb[28].mxu0 }
0x11d7   : > { %v1953_v38 = vmul.f32 -1.442695, %v1622_v37  ;;  %v1624_v39 = vpop.f32.mrb[29].mxu0 }
0x11d8   : > { %v1626_v15 = vpop.f32.mrb[30].mxu0 }
0x11d9   : > { %2362 = vpow2.f32 %v1953_v38  ;;  %v1627_v40 = vpop.f32.mrb[31].mxu0 }
0x11e3   : > { %v2363_v41 = vpop.eup %2362 }
0x11e4   : > { %v1632_v17 = vadd.f32 1.0, %v2363_v41 }
0x11e6   : > { %2364 = vrcp.f32 %v1632_v17 }
0x11f0   : > { %v2365_v42 = vpop.eup %2364 }
0x11f1   : > { %v1635_v43 = vmul.f32 %v2365_v42, %v1622_v37 }
0x11f3   : > { %v1636_v44 = vmul.f32 %v1635_v43, %v1624_v39 }
0x11f5   : > { %v1654_v45 = vpack.c.bf16 %v1636_v44, %v1636_v44 }
0x11f7   : > { %2200 = vmatmul.mubr.bf16.vlgmr.msra.gmra.mrb[24].mxu1 %v1654_v45 }
0x12ca   : > { %v1737_v14 = vpop.f32.mrb[24].mxu1 }
0x12cb   : > { %v1738_v47 = vadd.f32 %v1737_v14, %v2884_v9  ;;  %v2201_v48 = vpop.f32.mrb[25].mxu1 }
0x12cc   : > { %v1740_v49 = vpop.f32.mrb[26].mxu1 }
0x12cd   : > { %v2202_v50 = vpop.f32.mrb[27].mxu1  ;;  %v1744_v51 = vmul.f32 %v1738_v47, %v1738_v47 }
0x12cf   : > { %v1745_v52 = vsel %vm552_vm2, %v1744_v51, 0.0 }
0x12d0   : > { %1746 = vadd.xlane.f32.xlu1 %v1745_v52 }
0x135d   : > { %v1747_v53 = vpop.xlane.xlu1 %1746 }
0x135e   : > { %v1748_v54 = vmul.f32 0.015625, %v1747_v53 }
0x1360   : > { %v1749_v55 = vadd.f32 1e-06, %v1748_v54 }
0x1362   : > { %2366 = vrsqrt.f32 %v1749_v55 }
0x136c   : > { %v2367_v56 = vpop.eup %2366 }
0x136d   : > { %v1751_v58 = vmul.f32 %v2367_v56, %v1738_v47 }
0x136f   : > { %v1758_v61 = vmul.f32 %v1978_v57, %v1751_v58 }
0x1371   : > { %1759 = vst.msk [vmem:[%s430_s15] sm:$0xff] %vm552_vm2, %v1758_v61 }
0x1372   : > { %2381 = shalt.err (!%p2378_p3)
}
0x1373   : > { %s2382_s23 = scalar_lea.hbm %s2959_s26, 128  ;;  %s2386_s15 = scalar_lea.hbm %s3014_s12, 256 }
0x1374   : > { %p2383_p4 = scmp.ne.s32.totalorder %s2959_s26, %s2382_s23  ;;  %p2387_p9 = scmp.lt.u32.totalorder %s2959_s26, %s3014_s12 }
0x1375   : > { %p2388_p10 = scmp.lt.u32.totalorder %s2386_s15, %s2382_s23  ;;  %p2390_p12 = scmp.lt.u32.totalorder %s2382_s23, %s2959_s26 }
0x1376   : > { %p2384_p7 = pnand %p2383_p4, %p2547_p5 }
0x1377   : > { %p2389_p11 = por %p2388_p10, %p2387_p9 }
0x1378   : > { %p2385_p8 = pneg %p2384_p7 }
0x1379   : > { %p2391_p13 = por %p2390_p12, %p2389_p11 }
0x137b   : > { %p2392_p0 = pnand %p2391_p13, %p2385_p8 }
0x137d   : > { %2395 = shalt.err (!%p2392_p0)
}
0x137e   : > { %2227 = dma.vmem_to_hbm [thread:$0]  (%p2547_p5), %s2961_s16, 128, %s2959_s26, %s1761_s28  }
0x137f PF: > { %p2233_p1 = scmp.ge.s32.totalorder %s2430_s24, 2  ;;  %s1786_s29 = sand.u32 1, %s2418_s21  }
0x1380   : > { %s1787_s25 = scalar_lea.sflag [#allocation3], %s1786_s29 }
0x1381   : > { %p2230_p2 = pnand %p2233_p1, %p2551_p6 }
0x1383   : > { %2413 = dma.done.wait (!%p2230_p2), %s1787_s25, 128  }
0x1384   : > { %2415 = vsyncadd (!%p2230_p2), %s1787_s25, 4294967168  ;;  %s3029_s24 = sld [smem:[#allocation6_spill]]  ;;  %s3030_s30 = sld [smem:[#allocation5_spill]] }
0x1385   : > { %s3031_s23 = sld [smem:[#allocation7_spill]]  ;;  %s3032_s21 = smov %s2422_s22 }
0x138a   : > { %p22_p3 = scmp.ge.s32.totalorder %s3029_s24, 4   ;;  %s3033_s22 = smov %s3030_s30 }
0x138c   :  { %24 = sbr.rel (!%p22_p3) target bundleno = 3 (0x3), region = 116 }
0x1393   :  { %1792 = vsyncpa [#allocation3], 1 }
0x1394   :  { %1794 = vsyncpa [#allocation3 + $0x1], 1 }

</bundles_post_ra>
